<compile_context>
chip_gen: v6e
topology: v6e:2x2x1
jax: 0.10.0
libtpu: 0.0.40
codegen_flags: <defaults>
</compile_context>

<pallas_src>
import functools

import jax
import jax.numpy as jnp
from jax.experimental import pallas as pl
from jax.experimental.pallas import tpu as pltpu

EPS = 1e-5  # PyTorch InstanceNorm2d default eps
PHASES = ((0, 0), (0, 1), (1, 0), (1, 1))   # (rh, rw), phase index p = rh*2 + rw
TAPS = ((0, 0), (0, 1), (1, 0), (1, 1))     # (dh, dw), tap index  t = dh*2 + dw


@functools.partial(jax.jit,
                   static_argnames=("kernel_size", "stride", "padding", "compute_dtype"))
def upsampling_forward(x, w, gamma, beta, *, kernel_size=4, stride=2, padding=1,
                       compute_dtype=jnp.bfloat16):
    """ConvTranspose2d(k=4,s=2,p=1,bias=False) -> InstanceNorm2d(affine) -> ReLU.

    x: (N, C_in, H, W); w: (C_in, C_out, 4, 4)  (PyTorch ConvTranspose2d layout).
    """
    assert (kernel_size, stride, padding) == (4, 2, 1), "polyphase path assumes k=4,s=2,p=1"
    N, C_in, H, W = x.shape
    C_out = w.shape[1]
    Hq, Wq = H + 3, W + 2          # zero pad: 1 top / 2 bottom rows, 1 left / 1 right col
    HWl = H * Wq                   # per-phase output lattice (W valid + 2 junk cols / row)
    inv_cnt = 1.0 / float(4 * H * W)   # InstanceNorm counts ALL (2H)*(2W) output pixels

    # ---- host glue: pad + row-flatten the raw input (kernel HBM read ~= raw input) ----
    x_pad = jnp.pad(x, ((0, 0), (0, 0), (1, 2), (1, 1)))              # (N, C_in, Hq, Wq)
    x_flat = x_pad.reshape(N, C_in, Hq * Wq).astype(compute_dtype)    # (N, C_in, Hq*Wq)

    # ---- per-(phase, tap) weight matrices: (4, 4, C_out, C_in) ----
    # ConvTranspose scatter: out[2*q + rh] += x[q + rh + dh - 1] * w[kh],
    # with kh = 3 - rh - 2*dh (and the same along W).  No kernel flip needed.
    w_pt = jnp.stack([
        jnp.stack([w[:, :, 3 - rh - 2 * dh, 3 - rw - 2 * dw].T for (dh, dw) in TAPS])
        for (rh, rw) in PHASES
    ]).astype(compute_dtype)

    gamma2 = gamma.reshape(C_out, 1).astype(jnp.float32)
    beta2 = beta.reshape(C_out, 1).astype(jnp.float32)

    # 0/1 mask over the H*Wq lattice: 1 on the W valid columns of each row.
    mask = jnp.tile((jnp.arange(Wq) < W).astype(jnp.float32), H).reshape(1, HWl)

    def kernel(x_ref, w_ref, gamma_ref, beta_ref, mask_ref, out_ref, acc_ref):
        m = mask_ref[...]                                   # (1, HWl)  f32
        g = gamma_ref[...]                                  # (C_out, 1) f32
        bias = beta_ref[...]                                # (C_out, 1) f32
        xin = x_ref[0]                                      # (C_in, Hq*Wq) compute_dtype

        # Build the 9 shifted tap windows in VMEM (static lane slices, no HBM im2col).
        shifted = {}
        for a in range(3):
            for c in range(3):
                s = a * Wq + c
                shifted[(a, c)] = xin[:, s:s + HWl]         # (C_in, HWl)

        # ---- pass 1: polyphase conv per phase (MXU, f32 acc) + per-channel sums ----
        total = jnp.zeros((C_out, 1), jnp.float32)
        for p, (rh, rw) in enumerate(PHASES):
            acc = None
            for t, (dh, dw) in enumerate(TAPS):
                contrib = jnp.dot(w_ref[p, t], shifted[(rh + dh, rw + dw)],
                                  preferred_element_type=jnp.float32)  # (C_out, HWl)
                acc = contrib if acc is None else acc + contrib
            acc_ref[p] = acc
            total = total + jnp.sum(acc * m, axis=1, keepdims=True)
        mean = total * inv_cnt                               # (C_out, 1)

        # ---- pass 2: centered (biased) variance over all 4 phases, valid cols only ----
        ssq = jnp.zeros((C_out, 1), jnp.float32)
        for p in range(4):
            cm = (acc_ref[p] - mean) * m
            ssq = ssq + jnp.sum(cm * cm, axis=1, keepdims=True)
        var = ssq * inv_cnt
        scale = g * jax.lax.rsqrt(var + EPS)                 # gamma fused into the scale

        # ---- pass 3: normalize + affine + ReLU, write each phase slab ----
        for p in range(4):
            y = jnp.maximum((acc_ref[p] - mean) * scale + bias, 0.0)
            out_ref[0, p] = y.astype(out_ref.dtype)

    out_lat = pl.pallas_call(
        kernel,
        out_shape=jax.ShapeDtypeStruct((N, 4, C_out, HWl), x.dtype),
        grid_spec=pltpu.PrefetchScalarGridSpec(
            num_scalar_prefetch=0,
            grid=(N,),
            in_specs=[
                pl.BlockSpec((1, C_in, Hq * Wq), lambda n: (n, 0, 0)),
                pl.BlockSpec((4, 4, C_out, C_in), lambda n: (0, 0, 0, 0)),
                pl.BlockSpec((C_out, 1), lambda n: (0, 0)),
                pl.BlockSpec((C_out, 1), lambda n: (0, 0)),
                pl.BlockSpec((1, HWl), lambda n: (0, 0)),
            ],
            out_specs=pl.BlockSpec((1, 4, C_out, HWl), lambda n: (n, 0, 0, 0)),
            scratch_shapes=[pltpu.VMEM((4, C_out, HWl), jnp.float32)],
        ),
        compiler_params=pltpu.CompilerParams(
            dimension_semantics=("parallel",)),
    )(x_flat, w_pt, gamma2, beta2, mask)

    # ---- host glue: drop junk columns + pixel-shuffle the 4 phases back to NCHW ----
    out = out_lat.reshape(N, 2, 2, C_out, H, Wq)[:, :, :, :, :, :W]   # (n, rh, rw, c, qh, qw)
    out = out.transpose(0, 3, 4, 1, 5, 2).reshape(N, C_out, 2 * H, 2 * W)
    return out


def _reference(x, w, gamma, beta):
    """Pure-JAX reference: ConvTranspose2d -> InstanceNorm2d(affine) -> ReLU."""
    wf = jnp.flip(w, axis=(2, 3))                    # (C_in, C_out, k, k)
    conv = jax.lax.conv_general_dilated(
        x, jnp.transpose(wf, (1, 0, 2, 3)),          # OIHW
        window_strides=(1, 1), padding=[(2, 2), (2, 2)],
        lhs_dilation=(2, 2),
        dimension_numbers=("NCHW", "OIHW", "NCHW"))
    mean = conv.mean(axis=(2, 3), keepdims=True)
    var = conv.var(axis=(2, 3), keepdims=True)       # biased, like PyTorch InstanceNorm
    ref = (conv - mean) / jnp.sqrt(var + EPS)
    ref = ref * gamma[None, :, None, None] + beta[None, :, None, None]
    return jnp.maximum(ref, 0.0)


if __name__ == "__main__":
    key = jax.random.PRNGKey(0)
    k1, k2, k3, k4 = jax.random.split(key, 4)

    N, C_in, C_out, H, W = 2, 4, 8, 16, 16
    x = jax.random.normal(k1, (N, C_in, H, W), jnp.float32)
    # ConvTranspose2d weight layout: (in_channels, out_channels, kH, kW); bias=False
    w = 0.1 * jax.random.normal(k2, (C_in, C_out, 4, 4), jnp.float32)
    # InstanceNorm2d affine params (deterministic, nontrivial)
    gamma = 1.0 + 0.1 * jax.random.normal(k3, (C_out,), jnp.float32)
    beta = 0.1 * jax.random.normal(k4, (C_out,), jnp.float32)

    ref = _reference(x, w, gamma, beta)

    # f32 operands: tight check of the polyphase index / weight / stats plumbing.
    out_f32 = jax.block_until_ready(
        upsampling_forward(x, w, gamma, beta, compute_dtype=jnp.float32))
    assert out_f32.shape == (N, C_out, 2 * H, 2 * W), out_f32.shape
    assert jnp.allclose(out_f32, ref, atol=1e-4, rtol=1e-4), \
        float(jnp.max(jnp.abs(out_f32 - ref)))

    # bf16 operands (default, MXU-friendly): f32 accumulation + f32 stats -> looser tol.
    out = jax.block_until_ready(upsampling_forward(x, w, gamma, beta))
    assert out.shape == (N, C_out, 2 * H, 2 * W), out.shape
    max_err = float(jnp.max(jnp.abs(out - ref)))
    assert max_err < 5e-2, max_err

    print("KERNEL_OK")
</pallas_src>

<mosaic_0001>
module attributes {stable_mosaic.version = 11 : i64} {
  func.func @kernel(%arg0: i32, %arg1: memref<1x4x342xf32, #tpu.memory_space<vmem>>, %arg2: memref<4x4x8x4xf32, #tpu.memory_space<vmem>>, %arg3: memref<8x1xf32, #tpu.memory_space<vmem>>, %arg4: memref<8x1xf32, #tpu.memory_space<vmem>>, %arg5: memref<1x288xf32, #tpu.memory_space<vmem>>, %arg6: memref<1x4x8x288xf32, #tpu.memory_space<vmem>>, %arg7: memref<4x8x288xf32, #tpu.memory_space<vmem>>) attributes {dimension_semantics = [#tpu.dimension_semantics<parallel>], iteration_bounds = array<i64: 2>, scalar_prefetch = 0 : i64, scratch_operands = 1 : i64, tpu.core_type = #tpu.core_type<tc>, window_params = [{transform_indices = @transform_0, window_bounds = array<i64: 1, 4, 342>}, {pipeline_mode = #tpu.pipeline_mode<synchronous>, transform_indices = @transform_1, window_bounds = array<i64: 4, 4, 8, 4>}, {pipeline_mode = #tpu.pipeline_mode<synchronous>, transform_indices = @transform_2, window_bounds = array<i64: 8, 1>}, {pipeline_mode = #tpu.pipeline_mode<synchronous>, transform_indices = @transform_3, window_bounds = array<i64: 8, 1>}, {pipeline_mode = #tpu.pipeline_mode<synchronous>, transform_indices = @transform_4, window_bounds = array<i64: 1, 288>}, {transform_indices = @transform_5, window_bounds = array<i64: 1, 4, 8, 288>}]} {
    %c0 = arith.constant 0 : index
    %c0_0 = arith.constant 0 : index
    %0 = vector.load %arg5[%c0, %c0_0] : memref<1x288xf32, #tpu.memory_space<vmem>>, vector<1x288xf32>
    %c0_1 = arith.constant 0 : index
    %c0_2 = arith.constant 0 : index
    %1 = vector.load %arg3[%c0_1, %c0_2] : memref<8x1xf32, #tpu.memory_space<vmem>>, vector<8x1xf32>
    %c0_3 = arith.constant 0 : index
    %c0_4 = arith.constant 0 : index
    %2 = vector.load %arg4[%c0_3, %c0_4] : memref<8x1xf32, #tpu.memory_space<vmem>>, vector<8x1xf32>
    %c0_5 = arith.constant 0 : index
    %c0_6 = arith.constant 0 : index
    %c0_7 = arith.constant 0 : index
    %3 = vector.load %arg1[%c0_5, %c0_6, %c0_7] : memref<1x4x342xf32, #tpu.memory_space<vmem>>, vector<1x4x342xf32>
    %4 = vector.shape_cast %3 : vector<1x4x342xf32> to vector<4x342xf32>
    %5 = vector.extract_strided_slice %4 {offsets = [0, 0], sizes = [4, 288], strides = [1, 1]} : vector<4x342xf32> to vector<4x288xf32>
    %6 = vector.extract_strided_slice %4 {offsets = [0, 1], sizes = [4, 288], strides = [1, 1]} : vector<4x342xf32> to vector<4x288xf32>
    %7 = vector.extract_strided_slice %4 {offsets = [0, 2], sizes = [4, 288], strides = [1, 1]} : vector<4x342xf32> to vector<4x288xf32>
    %8 = vector.extract_strided_slice %4 {offsets = [0, 18], sizes = [4, 288], strides = [1, 1]} : vector<4x342xf32> to vector<4x288xf32>
    %9 = vector.extract_strided_slice %4 {offsets = [0, 19], sizes = [4, 288], strides = [1, 1]} : vector<4x342xf32> to vector<4x288xf32>
    %10 = vector.extract_strided_slice %4 {offsets = [0, 20], sizes = [4, 288], strides = [1, 1]} : vector<4x342xf32> to vector<4x288xf32>
    %11 = vector.extract_strided_slice %4 {offsets = [0, 36], sizes = [4, 288], strides = [1, 1]} : vector<4x342xf32> to vector<4x288xf32>
    %12 = vector.extract_strided_slice %4 {offsets = [0, 37], sizes = [4, 288], strides = [1, 1]} : vector<4x342xf32> to vector<4x288xf32>
    %13 = vector.extract_strided_slice %4 {offsets = [0, 38], sizes = [4, 288], strides = [1, 1]} : vector<4x342xf32> to vector<4x288xf32>
    %cst = arith.constant 0.000000e+00 : f32
    %14 = vector.broadcast %cst : f32 to vector<8x1xf32>
    %c0_8 = arith.constant 0 : index
    %c0_9 = arith.constant 0 : index
    %c0_10 = arith.constant 0 : index
    %c0_11 = arith.constant 0 : index
    %15 = vector.load %arg2[%c0_8, %c0_9, %c0_10, %c0_11] : memref<4x4x8x4xf32, #tpu.memory_space<vmem>>, vector<1x1x8x4xf32>
    %16 = vector.shape_cast %15 : vector<1x1x8x4xf32> to vector<8x4xf32>
    %cst_12 = arith.constant dense<0.000000e+00> : vector<8x288xf32>
    %17 = tpu.matmul %16, %5, %cst_12 {dimension_numbers = #tpu.dot_dimension_numbers<[1], [0], [0], [1], [0, 0, 1, 1], [], []>} : vector<8x4xf32>, vector<4x288xf32>, vector<8x288xf32> -> vector<8x288xf32>
    %c0_13 = arith.constant 0 : index
    %c1 = arith.constant 1 : index
    %c0_14 = arith.constant 0 : index
    %c0_15 = arith.constant 0 : index
    %18 = vector.load %arg2[%c0_13, %c1, %c0_14, %c0_15] : memref<4x4x8x4xf32, #tpu.memory_space<vmem>>, vector<1x1x8x4xf32>
    %19 = vector.shape_cast %18 : vector<1x1x8x4xf32> to vector<8x4xf32>
    %cst_16 = arith.constant dense<0.000000e+00> : vector<8x288xf32>
    %20 = tpu.matmul %19, %6, %cst_16 {dimension_numbers = #tpu.dot_dimension_numbers<[1], [0], [0], [1], [0, 0, 1, 1], [], []>} : vector<8x4xf32>, vector<4x288xf32>, vector<8x288xf32> -> vector<8x288xf32>
    %21 = arith.addf %17, %20 : vector<8x288xf32>
    %c0_17 = arith.constant 0 : index
    %c2 = arith.constant 2 : index
    %c0_18 = arith.constant 0 : index
    %c0_19 = arith.constant 0 : index
    %22 = vector.load %arg2[%c0_17, %c2, %c0_18, %c0_19] : memref<4x4x8x4xf32, #tpu.memory_space<vmem>>, vector<1x1x8x4xf32>
    %23 = vector.shape_cast %22 : vector<1x1x8x4xf32> to vector<8x4xf32>
    %cst_20 = arith.constant dense<0.000000e+00> : vector<8x288xf32>
    %24 = tpu.matmul %23, %8, %cst_20 {dimension_numbers = #tpu.dot_dimension_numbers<[1], [0], [0], [1], [0, 0, 1, 1], [], []>} : vector<8x4xf32>, vector<4x288xf32>, vector<8x288xf32> -> vector<8x288xf32>
    %25 = arith.addf %21, %24 : vector<8x288xf32>
    %c0_21 = arith.constant 0 : index
    %c3 = arith.constant 3 : index
    %c0_22 = arith.constant 0 : index
    %c0_23 = arith.constant 0 : index
    %26 = vector.load %arg2[%c0_21, %c3, %c0_22, %c0_23] : memref<4x4x8x4xf32, #tpu.memory_space<vmem>>, vector<1x1x8x4xf32>
    %27 = vector.shape_cast %26 : vector<1x1x8x4xf32> to vector<8x4xf32>
    %cst_24 = arith.constant dense<0.000000e+00> : vector<8x288xf32>
    %28 = tpu.matmul %27, %9, %cst_24 {dimension_numbers = #tpu.dot_dimension_numbers<[1], [0], [0], [1], [0, 0, 1, 1], [], []>} : vector<8x4xf32>, vector<4x288xf32>, vector<8x288xf32> -> vector<8x288xf32>
    %29 = arith.addf %25, %28 : vector<8x288xf32>
    %c0_25 = arith.constant 0 : index
    %c0_26 = arith.constant 0 : index
    %c0_27 = arith.constant 0 : index
    %30 = vector.load %arg7[%c0_25, %c0_26, %c0_27] : memref<4x8x288xf32, #tpu.memory_space<vmem>>, vector<1x8x288xf32>
    %31 = vector.shape_cast %30 : vector<1x8x288xf32> to vector<8x288xf32>
    %32 = vector.shape_cast %29 : vector<8x288xf32> to vector<1x8x288xf32>
    tpu.vector_store %arg7[%c0_25, %c0_26, %c0_27], %32 {strides = array<i32>} : memref<4x8x288xf32, #tpu.memory_space<vmem>>, vector<1x8x288xf32>,
    %33 = vector.broadcast %0 : vector<1x288xf32> to vector<8x288xf32>
    %34 = arith.mulf %29, %33 : vector<8x288xf32>
    %cst_28 = arith.constant dense<0.000000e+00> : vector<8xf32>
    %35 = vector.multi_reduction <add>, %34, %cst_28 [1] : vector<8x288xf32> to vector<8xf32>
    %36 = vector.shape_cast %35 : vector<8xf32> to vector<8x1xf32>
    %37 = arith.addf %14, %36 : vector<8x1xf32>
    %c1_29 = arith.constant 1 : index
    %c0_30 = arith.constant 0 : index
    %c0_31 = arith.constant 0 : index
    %c0_32 = arith.constant 0 : index
    %38 = vector.load %arg2[%c1_29, %c0_30, %c0_31, %c0_32] : memref<4x4x8x4xf32, #tpu.memory_space<vmem>>, vector<1x1x8x4xf32>
    %39 = vector.shape_cast %38 : vector<1x1x8x4xf32> to vector<8x4xf32>
    %cst_33 = arith.constant dense<0.000000e+00> : vector<8x288xf32>
    %40 = tpu.matmul %39, %6, %cst_33 {dimension_numbers = #tpu.dot_dimension_numbers<[1], [0], [0], [1], [0, 0, 1, 1], [], []>} : vector<8x4xf32>, vector<4x288xf32>, vector<8x288xf32> -> vector<8x288xf32>
    %c1_34 = arith.constant 1 : index
    %c1_35 = arith.constant 1 : index
    %c0_36 = arith.constant 0 : index
    %c0_37 = arith.constant 0 : index
    %41 = vector.load %arg2[%c1_34, %c1_35, %c0_36, %c0_37] : memref<4x4x8x4xf32, #tpu.memory_space<vmem>>, vector<1x1x8x4xf32>
    %42 = vector.shape_cast %41 : vector<1x1x8x4xf32> to vector<8x4xf32>
    %cst_38 = arith.constant dense<0.000000e+00> : vector<8x288xf32>
    %43 = tpu.matmul %42, %7, %cst_38 {dimension_numbers = #tpu.dot_dimension_numbers<[1], [0], [0], [1], [0, 0, 1, 1], [], []>} : vector<8x4xf32>, vector<4x288xf32>, vector<8x288xf32> -> vector<8x288xf32>
    %44 = arith.addf %40, %43 : vector<8x288xf32>
    %c1_39 = arith.constant 1 : index
    %c2_40 = arith.constant 2 : index
    %c0_41 = arith.constant 0 : index
    %c0_42 = arith.constant 0 : index
    %45 = vector.load %arg2[%c1_39, %c2_40, %c0_41, %c0_42] : memref<4x4x8x4xf32, #tpu.memory_space<vmem>>, vector<1x1x8x4xf32>
    %46 = vector.shape_cast %45 : vector<1x1x8x4xf32> to vector<8x4xf32>
    %cst_43 = arith.constant dense<0.000000e+00> : vector<8x288xf32>
    %47 = tpu.matmul %46, %9, %cst_43 {dimension_numbers = #tpu.dot_dimension_numbers<[1], [0], [0], [1], [0, 0, 1, 1], [], []>} : vector<8x4xf32>, vector<4x288xf32>, vector<8x288xf32> -> vector<8x288xf32>
    %48 = arith.addf %44, %47 : vector<8x288xf32>
    %c1_44 = arith.constant 1 : index
    %c3_45 = arith.constant 3 : index
    %c0_46 = arith.constant 0 : index
    %c0_47 = arith.constant 0 : index
    %49 = vector.load %arg2[%c1_44, %c3_45, %c0_46, %c0_47] : memref<4x4x8x4xf32, #tpu.memory_space<vmem>>, vector<1x1x8x4xf32>
    %50 = vector.shape_cast %49 : vector<1x1x8x4xf32> to vector<8x4xf32>
    %cst_48 = arith.constant dense<0.000000e+00> : vector<8x288xf32>
    %51 = tpu.matmul %50, %10, %cst_48 {dimension_numbers = #tpu.dot_dimension_numbers<[1], [0], [0], [1], [0, 0, 1, 1], [], []>} : vector<8x4xf32>, vector<4x288xf32>, vector<8x288xf32> -> vector<8x288xf32>
    %52 = arith.addf %48, %51 : vector<8x288xf32>
    %c1_49 = arith.constant 1 : index
    %c0_50 = arith.constant 0 : index
    %c0_51 = arith.constant 0 : index
    %53 = vector.load %arg7[%c1_49, %c0_50, %c0_51] : memref<4x8x288xf32, #tpu.memory_space<vmem>>, vector<1x8x288xf32>
    %54 = vector.shape_cast %53 : vector<1x8x288xf32> to vector<8x288xf32>
    %55 = vector.shape_cast %52 : vector<8x288xf32> to vector<1x8x288xf32>
    tpu.vector_store %arg7[%c1_49, %c0_50, %c0_51], %55 {strides = array<i32>} : memref<4x8x288xf32, #tpu.memory_space<vmem>>, vector<1x8x288xf32>,
    %56 = vector.broadcast %0 : vector<1x288xf32> to vector<8x288xf32>
    %57 = arith.mulf %52, %56 : vector<8x288xf32>
    %cst_52 = arith.constant dense<0.000000e+00> : vector<8xf32>
    %58 = vector.multi_reduction <add>, %57, %cst_52 [1] : vector<8x288xf32> to vector<8xf32>
    %59 = vector.shape_cast %58 : vector<8xf32> to vector<8x1xf32>
    %60 = arith.addf %37, %59 : vector<8x1xf32>
    %c2_53 = arith.constant 2 : index
    %c0_54 = arith.constant 0 : index
    %c0_55 = arith.constant 0 : index
    %c0_56 = arith.constant 0 : index
    %61 = vector.load %arg2[%c2_53, %c0_54, %c0_55, %c0_56] : memref<4x4x8x4xf32, #tpu.memory_space<vmem>>, vector<1x1x8x4xf32>
    %62 = vector.shape_cast %61 : vector<1x1x8x4xf32> to vector<8x4xf32>
    %cst_57 = arith.constant dense<0.000000e+00> : vector<8x288xf32>
    %63 = tpu.matmul %62, %8, %cst_57 {dimension_numbers = #tpu.dot_dimension_numbers<[1], [0], [0], [1], [0, 0, 1, 1], [], []>} : vector<8x4xf32>, vector<4x288xf32>, vector<8x288xf32> -> vector<8x288xf32>
    %c2_58 = arith.constant 2 : index
    %c1_59 = arith.constant 1 : index
    %c0_60 = arith.constant 0 : index
    %c0_61 = arith.constant 0 : index
    %64 = vector.load %arg2[%c2_58, %c1_59, %c0_60, %c0_61] : memref<4x4x8x4xf32, #tpu.memory_space<vmem>>, vector<1x1x8x4xf32>
    %65 = vector.shape_cast %64 : vector<1x1x8x4xf32> to vector<8x4xf32>
    %cst_62 = arith.constant dense<0.000000e+00> : vector<8x288xf32>
    %66 = tpu.matmul %65, %9, %cst_62 {dimension_numbers = #tpu.dot_dimension_numbers<[1], [0], [0], [1], [0, 0, 1, 1], [], []>} : vector<8x4xf32>, vector<4x288xf32>, vector<8x288xf32> -> vector<8x288xf32>
    %67 = arith.addf %63, %66 : vector<8x288xf32>
    %c2_63 = arith.constant 2 : index
    %c2_64 = arith.constant 2 : index
    %c0_65 = arith.constant 0 : index
    %c0_66 = arith.constant 0 : index
    %68 = vector.load %arg2[%c2_63, %c2_64, %c0_65, %c0_66] : memref<4x4x8x4xf32, #tpu.memory_space<vmem>>, vector<1x1x8x4xf32>
    %69 = vector.shape_cast %68 : vector<1x1x8x4xf32> to vector<8x4xf32>
    %cst_67 = arith.constant dense<0.000000e+00> : vector<8x288xf32>
    %70 = tpu.matmul %69, %11, %cst_67 {dimension_numbers = #tpu.dot_dimension_numbers<[1], [0], [0], [1], [0, 0, 1, 1], [], []>} : vector<8x4xf32>, vector<4x288xf32>, vector<8x288xf32> -> vector<8x288xf32>
    %71 = arith.addf %67, %70 : vector<8x288xf32>
    %c2_68 = arith.constant 2 : index
    %c3_69 = arith.constant 3 : index
    %c0_70 = arith.constant 0 : index
    %c0_71 = arith.constant 0 : index
    %72 = vector.load %arg2[%c2_68, %c3_69, %c0_70, %c0_71] : memref<4x4x8x4xf32, #tpu.memory_space<vmem>>, vector<1x1x8x4xf32>
    %73 = vector.shape_cast %72 : vector<1x1x8x4xf32> to vector<8x4xf32>
    %cst_72 = arith.constant dense<0.000000e+00> : vector<8x288xf32>
    %74 = tpu.matmul %73, %12, %cst_72 {dimension_numbers = #tpu.dot_dimension_numbers<[1], [0], [0], [1], [0, 0, 1, 1], [], []>} : vector<8x4xf32>, vector<4x288xf32>, vector<8x288xf32> -> vector<8x288xf32>
    %75 = arith.addf %71, %74 : vector<8x288xf32>
    %c2_73 = arith.constant 2 : index
    %c0_74 = arith.constant 0 : index
    %c0_75 = arith.constant 0 : index
    %76 = vector.load %arg7[%c2_73, %c0_74, %c0_75] : memref<4x8x288xf32, #tpu.memory_space<vmem>>, vector<1x8x288xf32>
    %77 = vector.shape_cast %76 : vector<1x8x288xf32> to vector<8x288xf32>
    %78 = vector.shape_cast %75 : vector<8x288xf32> to vector<1x8x288xf32>
    tpu.vector_store %arg7[%c2_73, %c0_74, %c0_75], %78 {strides = array<i32>} : memref<4x8x288xf32, #tpu.memory_space<vmem>>, vector<1x8x288xf32>,
    %79 = vector.broadcast %0 : vector<1x288xf32> to vector<8x288xf32>
    %80 = arith.mulf %75, %79 : vector<8x288xf32>
    %cst_76 = arith.constant dense<0.000000e+00> : vector<8xf32>
    %81 = vector.multi_reduction <add>, %80, %cst_76 [1] : vector<8x288xf32> to vector<8xf32>
    %82 = vector.shape_cast %81 : vector<8xf32> to vector<8x1xf32>
    %83 = arith.addf %60, %82 : vector<8x1xf32>
    %c3_77 = arith.constant 3 : index
    %c0_78 = arith.constant 0 : index
    %c0_79 = arith.constant 0 : index
    %c0_80 = arith.constant 0 : index
    %84 = vector.load %arg2[%c3_77, %c0_78, %c0_79, %c0_80] : memref<4x4x8x4xf32, #tpu.memory_space<vmem>>, vector<1x1x8x4xf32>
    %85 = vector.shape_cast %84 : vector<1x1x8x4xf32> to vector<8x4xf32>
    %cst_81 = arith.constant dense<0.000000e+00> : vector<8x288xf32>
    %86 = tpu.matmul %85, %9, %cst_81 {dimension_numbers = #tpu.dot_dimension_numbers<[1], [0], [0], [1], [0, 0, 1, 1], [], []>} : vector<8x4xf32>, vector<4x288xf32>, vector<8x288xf32> -> vector<8x288xf32>
    %c3_82 = arith.constant 3 : index
    %c1_83 = arith.constant 1 : index
    %c0_84 = arith.constant 0 : index
    %c0_85 = arith.constant 0 : index
    %87 = vector.load %arg2[%c3_82, %c1_83, %c0_84, %c0_85] : memref<4x4x8x4xf32, #tpu.memory_space<vmem>>, vector<1x1x8x4xf32>
    %88 = vector.shape_cast %87 : vector<1x1x8x4xf32> to vector<8x4xf32>
    %cst_86 = arith.constant dense<0.000000e+00> : vector<8x288xf32>
    %89 = tpu.matmul %88, %10, %cst_86 {dimension_numbers = #tpu.dot_dimension_numbers<[1], [0], [0], [1], [0, 0, 1, 1], [], []>} : vector<8x4xf32>, vector<4x288xf32>, vector<8x288xf32> -> vector<8x288xf32>
    %90 = arith.addf %86, %89 : vector<8x288xf32>
    %c3_87 = arith.constant 3 : index
    %c2_88 = arith.constant 2 : index
    %c0_89 = arith.constant 0 : index
    %c0_90 = arith.constant 0 : index
    %91 = vector.load %arg2[%c3_87, %c2_88, %c0_89, %c0_90] : memref<4x4x8x4xf32, #tpu.memory_space<vmem>>, vector<1x1x8x4xf32>
    %92 = vector.shape_cast %91 : vector<1x1x8x4xf32> to vector<8x4xf32>
    %cst_91 = arith.constant dense<0.000000e+00> : vector<8x288xf32>
    %93 = tpu.matmul %92, %12, %cst_91 {dimension_numbers = #tpu.dot_dimension_numbers<[1], [0], [0], [1], [0, 0, 1, 1], [], []>} : vector<8x4xf32>, vector<4x288xf32>, vector<8x288xf32> -> vector<8x288xf32>
    %94 = arith.addf %90, %93 : vector<8x288xf32>
    %c3_92 = arith.constant 3 : index
    %c3_93 = arith.constant 3 : index
    %c0_94 = arith.constant 0 : index
    %c0_95 = arith.constant 0 : index
    %95 = vector.load %arg2[%c3_92, %c3_93, %c0_94, %c0_95] : memref<4x4x8x4xf32, #tpu.memory_space<vmem>>, vector<1x1x8x4xf32>
    %96 = vector.shape_cast %95 : vector<1x1x8x4xf32> to vector<8x4xf32>
    %cst_96 = arith.constant dense<0.000000e+00> : vector<8x288xf32>
    %97 = tpu.matmul %96, %13, %cst_96 {dimension_numbers = #tpu.dot_dimension_numbers<[1], [0], [0], [1], [0, 0, 1, 1], [], []>} : vector<8x4xf32>, vector<4x288xf32>, vector<8x288xf32> -> vector<8x288xf32>
    %98 = arith.addf %94, %97 : vector<8x288xf32>
    %c3_97 = arith.constant 3 : index
    %c0_98 = arith.constant 0 : index
    %c0_99 = arith.constant 0 : index
    %99 = vector.load %arg7[%c3_97, %c0_98, %c0_99] : memref<4x8x288xf32, #tpu.memory_space<vmem>>, vector<1x8x288xf32>
    %100 = vector.shape_cast %99 : vector<1x8x288xf32> to vector<8x288xf32>
    %101 = vector.shape_cast %98 : vector<8x288xf32> to vector<1x8x288xf32>
    tpu.vector_store %arg7[%c3_97, %c0_98, %c0_99], %101 {strides = array<i32>} : memref<4x8x288xf32, #tpu.memory_space<vmem>>, vector<1x8x288xf32>,
    %102 = vector.broadcast %0 : vector<1x288xf32> to vector<8x288xf32>
    %103 = arith.mulf %98, %102 : vector<8x288xf32>
    %cst_100 = arith.constant dense<0.000000e+00> : vector<8xf32>
    %104 = vector.multi_reduction <add>, %103, %cst_100 [1] : vector<8x288xf32> to vector<8xf32>
    %105 = vector.shape_cast %104 : vector<8xf32> to vector<8x1xf32>
    %106 = arith.addf %83, %105 : vector<8x1xf32>
    %cst_101 = arith.constant 9.765625E-4 : f32
    %107 = vector.broadcast %cst_101 : f32 to vector<8x1xf32>
    %108 = arith.mulf %106, %107 : vector<8x1xf32>
    %cst_102 = arith.constant 0.000000e+00 : f32
    %109 = vector.broadcast %cst_102 : f32 to vector<8x1xf32>
    %c0_103 = arith.constant 0 : index
    %c0_104 = arith.constant 0 : index
    %c0_105 = arith.constant 0 : index
    %110 = vector.load %arg7[%c0_103, %c0_104, %c0_105] : memref<4x8x288xf32, #tpu.memory_space<vmem>>, vector<1x8x288xf32>
    %111 = vector.shape_cast %110 : vector<1x8x288xf32> to vector<8x288xf32>
    %112 = vector.broadcast %108 : vector<8x1xf32> to vector<8x288xf32>
    %113 = arith.subf %111, %112 : vector<8x288xf32>
    %114 = vector.broadcast %0 : vector<1x288xf32> to vector<8x288xf32>
    %115 = arith.mulf %113, %114 : vector<8x288xf32>
    %116 = arith.mulf %115, %115 : vector<8x288xf32>
    %cst_106 = arith.constant dense<0.000000e+00> : vector<8xf32>
    %117 = vector.multi_reduction <add>, %116, %cst_106 [1] : vector<8x288xf32> to vector<8xf32>
    %118 = vector.shape_cast %117 : vector<8xf32> to vector<8x1xf32>
    %119 = arith.addf %109, %118 : vector<8x1xf32>
    %c1_107 = arith.constant 1 : index
    %c0_108 = arith.constant 0 : index
    %c0_109 = arith.constant 0 : index
    %120 = vector.load %arg7[%c1_107, %c0_108, %c0_109] : memref<4x8x288xf32, #tpu.memory_space<vmem>>, vector<1x8x288xf32>
    %121 = vector.shape_cast %120 : vector<1x8x288xf32> to vector<8x288xf32>
    %122 = vector.broadcast %108 : vector<8x1xf32> to vector<8x288xf32>
    %123 = arith.subf %121, %122 : vector<8x288xf32>
    %124 = vector.broadcast %0 : vector<1x288xf32> to vector<8x288xf32>
    %125 = arith.mulf %123, %124 : vector<8x288xf32>
    %126 = arith.mulf %125, %125 : vector<8x288xf32>
    %cst_110 = arith.constant dense<0.000000e+00> : vector<8xf32>
    %127 = vector.multi_reduction <add>, %126, %cst_110 [1] : vector<8x288xf32> to vector<8xf32>
    %128 = vector.shape_cast %127 : vector<8xf32> to vector<8x1xf32>
    %129 = arith.addf %119, %128 : vector<8x1xf32>
    %c2_111 = arith.constant 2 : index
    %c0_112 = arith.constant 0 : index
    %c0_113 = arith.constant 0 : index
    %130 = vector.load %arg7[%c2_111, %c0_112, %c0_113] : memref<4x8x288xf32, #tpu.memory_space<vmem>>, vector<1x8x288xf32>
    %131 = vector.shape_cast %130 : vector<1x8x288xf32> to vector<8x288xf32>
    %132 = vector.broadcast %108 : vector<8x1xf32> to vector<8x288xf32>
    %133 = arith.subf %131, %132 : vector<8x288xf32>
    %134 = vector.broadcast %0 : vector<1x288xf32> to vector<8x288xf32>
    %135 = arith.mulf %133, %134 : vector<8x288xf32>
    %136 = arith.mulf %135, %135 : vector<8x288xf32>
    %cst_114 = arith.constant dense<0.000000e+00> : vector<8xf32>
    %137 = vector.multi_reduction <add>, %136, %cst_114 [1] : vector<8x288xf32> to vector<8xf32>
    %138 = vector.shape_cast %137 : vector<8xf32> to vector<8x1xf32>
    %139 = arith.addf %129, %138 : vector<8x1xf32>
    %c3_115 = arith.constant 3 : index
    %c0_116 = arith.constant 0 : index
    %c0_117 = arith.constant 0 : index
    %140 = vector.load %arg7[%c3_115, %c0_116, %c0_117] : memref<4x8x288xf32, #tpu.memory_space<vmem>>, vector<1x8x288xf32>
    %141 = vector.shape_cast %140 : vector<1x8x288xf32> to vector<8x288xf32>
    %142 = vector.broadcast %108 : vector<8x1xf32> to vector<8x288xf32>
    %143 = arith.subf %141, %142 : vector<8x288xf32>
    %144 = vector.broadcast %0 : vector<1x288xf32> to vector<8x288xf32>
    %145 = arith.mulf %143, %144 : vector<8x288xf32>
    %146 = arith.mulf %145, %145 : vector<8x288xf32>
    %cst_118 = arith.constant dense<0.000000e+00> : vector<8xf32>
    %147 = vector.multi_reduction <add>, %146, %cst_118 [1] : vector<8x288xf32> to vector<8xf32>
    %148 = vector.shape_cast %147 : vector<8xf32> to vector<8x1xf32>
    %149 = arith.addf %139, %148 : vector<8x1xf32>
    %cst_119 = arith.constant 9.765625E-4 : f32
    %150 = vector.broadcast %cst_119 : f32 to vector<8x1xf32>
    %151 = arith.mulf %149, %150 : vector<8x1xf32>
    %cst_120 = arith.constant 9.99999974E-6 : f32
    %152 = vector.broadcast %cst_120 : f32 to vector<8x1xf32>
    %153 = arith.addf %151, %152 : vector<8x1xf32>
    %154 = math.rsqrt %153 : vector<8x1xf32>
    %155 = arith.mulf %1, %154 : vector<8x1xf32>
    %c0_121 = arith.constant 0 : index
    %c0_122 = arith.constant 0 : index
    %c0_123 = arith.constant 0 : index
    %156 = vector.load %arg7[%c0_121, %c0_122, %c0_123] : memref<4x8x288xf32, #tpu.memory_space<vmem>>, vector<1x8x288xf32>
    %157 = vector.shape_cast %156 : vector<1x8x288xf32> to vector<8x288xf32>
    %158 = vector.broadcast %108 : vector<8x1xf32> to vector<8x288xf32>
    %159 = arith.subf %157, %158 : vector<8x288xf32>
    %160 = vector.broadcast %155 : vector<8x1xf32> to vector<8x288xf32>
    %161 = arith.mulf %159, %160 : vector<8x288xf32>
    %162 = vector.broadcast %2 : vector<8x1xf32> to vector<8x288xf32>
    %163 = arith.addf %161, %162 : vector<8x288xf32>
    %cst_124 = arith.constant 0.000000e+00 : f32
    %164 = vector.broadcast %cst_124 : f32 to vector<8x288xf32>
    %165 = arith.maximumf %163, %164 : vector<8x288xf32>
    %c0_125 = arith.constant 0 : index
    %c0_126 = arith.constant 0 : index
    %c0_127 = arith.constant 0 : index
    %c0_128 = arith.constant 0 : index
    %166 = vector.load %arg6[%c0_125, %c0_126, %c0_127, %c0_128] : memref<1x4x8x288xf32, #tpu.memory_space<vmem>>, vector<1x1x8x288xf32>
    %167 = vector.shape_cast %166 : vector<1x1x8x288xf32> to vector<8x288xf32>
    %168 = vector.shape_cast %165 : vector<8x288xf32> to vector<1x1x8x288xf32>
    tpu.vector_store %arg6[%c0_125, %c0_126, %c0_127, %c0_128], %168 {strides = array<i32>} : memref<1x4x8x288xf32, #tpu.memory_space<vmem>>, vector<1x1x8x288xf32>,
    %c1_129 = arith.constant 1 : index
    %c0_130 = arith.constant 0 : index
    %c0_131 = arith.constant 0 : index
    %169 = vector.load %arg7[%c1_129, %c0_130, %c0_131] : memref<4x8x288xf32, #tpu.memory_space<vmem>>, vector<1x8x288xf32>
    %170 = vector.shape_cast %169 : vector<1x8x288xf32> to vector<8x288xf32>
    %171 = vector.broadcast %108 : vector<8x1xf32> to vector<8x288xf32>
    %172 = arith.subf %170, %171 : vector<8x288xf32>
    %173 = vector.broadcast %155 : vector<8x1xf32> to vector<8x288xf32>
    %174 = arith.mulf %172, %173 : vector<8x288xf32>
    %175 = vector.broadcast %2 : vector<8x1xf32> to vector<8x288xf32>
    %176 = arith.addf %174, %175 : vector<8x288xf32>
    %cst_132 = arith.constant 0.000000e+00 : f32
    %177 = vector.broadcast %cst_132 : f32 to vector<8x288xf32>
    %178 = arith.maximumf %176, %177 : vector<8x288xf32>
    %c0_133 = arith.constant 0 : index
    %c1_134 = arith.constant 1 : index
    %c0_135 = arith.constant 0 : index
    %c0_136 = arith.constant 0 : index
    %179 = vector.load %arg6[%c0_133, %c1_134, %c0_135, %c0_136] : memref<1x4x8x288xf32, #tpu.memory_space<vmem>>, vector<1x1x8x288xf32>
    %180 = vector.shape_cast %179 : vector<1x1x8x288xf32> to vector<8x288xf32>
    %181 = vector.shape_cast %178 : vector<8x288xf32> to vector<1x1x8x288xf32>
    tpu.vector_store %arg6[%c0_133, %c1_134, %c0_135, %c0_136], %181 {strides = array<i32>} : memref<1x4x8x288xf32, #tpu.memory_space<vmem>>, vector<1x1x8x288xf32>,
    %c2_137 = arith.constant 2 : index
    %c0_138 = arith.constant 0 : index
    %c0_139 = arith.constant 0 : index
    %182 = vector.load %arg7[%c2_137, %c0_138, %c0_139] : memref<4x8x288xf32, #tpu.memory_space<vmem>>, vector<1x8x288xf32>
    %183 = vector.shape_cast %182 : vector<1x8x288xf32> to vector<8x288xf32>
    %184 = vector.broadcast %108 : vector<8x1xf32> to vector<8x288xf32>
    %185 = arith.subf %183, %184 : vector<8x288xf32>
    %186 = vector.broadcast %155 : vector<8x1xf32> to vector<8x288xf32>
    %187 = arith.mulf %185, %186 : vector<8x288xf32>
    %188 = vector.broadcast %2 : vector<8x1xf32> to vector<8x288xf32>
    %189 = arith.addf %187, %188 : vector<8x288xf32>
    %cst_140 = arith.constant 0.000000e+00 : f32
    %190 = vector.broadcast %cst_140 : f32 to vector<8x288xf32>
    %191 = arith.maximumf %189, %190 : vector<8x288xf32>
    %c0_141 = arith.constant 0 : index
    %c2_142 = arith.constant 2 : index
    %c0_143 = arith.constant 0 : index
    %c0_144 = arith.constant 0 : index
    %192 = vector.load %arg6[%c0_141, %c2_142, %c0_143, %c0_144] : memref<1x4x8x288xf32, #tpu.memory_space<vmem>>, vector<1x1x8x288xf32>
    %193 = vector.shape_cast %192 : vector<1x1x8x288xf32> to vector<8x288xf32>
    %194 = vector.shape_cast %191 : vector<8x288xf32> to vector<1x1x8x288xf32>
    tpu.vector_store %arg6[%c0_141, %c2_142, %c0_143, %c0_144], %194 {strides = array<i32>} : memref<1x4x8x288xf32, #tpu.memory_space<vmem>>, vector<1x1x8x288xf32>,
    %c3_145 = arith.constant 3 : index
    %c0_146 = arith.constant 0 : index
    %c0_147 = arith.constant 0 : index
    %195 = vector.load %arg7[%c3_145, %c0_146, %c0_147] : memref<4x8x288xf32, #tpu.memory_space<vmem>>, vector<1x8x288xf32>
    %196 = vector.shape_cast %195 : vector<1x8x288xf32> to vector<8x288xf32>
    %197 = vector.broadcast %108 : vector<8x1xf32> to vector<8x288xf32>
    %198 = arith.subf %196, %197 : vector<8x288xf32>
    %199 = vector.broadcast %155 : vector<8x1xf32> to vector<8x288xf32>
    %200 = arith.mulf %198, %199 : vector<8x288xf32>
    %201 = vector.broadcast %2 : vector<8x1xf32> to vector<8x288xf32>
    %202 = arith.addf %200, %201 : vector<8x288xf32>
    %cst_148 = arith.constant 0.000000e+00 : f32
    %203 = vector.broadcast %cst_148 : f32 to vector<8x288xf32>
    %204 = arith.maximumf %202, %203 : vector<8x288xf32>
    %c0_149 = arith.constant 0 : index
    %c3_150 = arith.constant 3 : index
    %c0_151 = arith.constant 0 : index
    %c0_152 = arith.constant 0 : index
    %205 = vector.load %arg6[%c0_149, %c3_150, %c0_151, %c0_152] : memref<1x4x8x288xf32, #tpu.memory_space<vmem>>, vector<1x1x8x288xf32>
    %206 = vector.shape_cast %205 : vector<1x1x8x288xf32> to vector<8x288xf32>
    %207 = vector.shape_cast %204 : vector<8x288xf32> to vector<1x1x8x288xf32>
    tpu.vector_store %arg6[%c0_149, %c3_150, %c0_151, %c0_152], %207 {strides = array<i32>} : memref<1x4x8x288xf32, #tpu.memory_space<vmem>>, vector<1x1x8x288xf32>,
    return
  }
  func.func @transform_0(%arg0: i32) -> (i32, i32, i32) {
    %c0_i32 = arith.constant 0 : i32
    %c0_i32_0 = arith.constant 0 : i32
    %c0_i32_1 = arith.constant 0 : i32
    return %arg0, %c0_i32, %c0_i32_0 : i32, i32, i32
  }
  func.func @transform_1(%arg0: i32) -> (i32, i32, i32, i32) {
    %c0_i32 = arith.constant 0 : i32
    %c0_i32_0 = arith.constant 0 : i32
    %c0_i32_1 = arith.constant 0 : i32
    %c0_i32_2 = arith.constant 0 : i32
    %c0_i32_3 = arith.constant 0 : i32
    return %c0_i32, %c0_i32_0, %c0_i32_1, %c0_i32_2 : i32, i32, i32, i32
  }
  func.func @transform_2(%arg0: i32) -> (i32, i32) {
    %c0_i32 = arith.constant 0 : i32
    %c0_i32_0 = arith.constant 0 : i32
    %c0_i32_1 = arith.constant 0 : i32
    return %c0_i32, %c0_i32_0 : i32, i32
  }
  func.func @transform_3(%arg0: i32) -> (i32, i32) {
    %c0_i32 = arith.constant 0 : i32
    %c0_i32_0 = arith.constant 0 : i32
    %c0_i32_1 = arith.constant 0 : i32
    return %c0_i32, %c0_i32_0 : i32, i32
  }
  func.func @transform_4(%arg0: i32) -> (i32, i32) {
    %c0_i32 = arith.constant 0 : i32
    %c0_i32_0 = arith.constant 0 : i32
    %c0_i32_1 = arith.constant 0 : i32
    return %c0_i32, %c0_i32_0 : i32, i32
  }
  func.func @transform_5(%arg0: i32) -> (i32, i32, i32, i32) {
    %c0_i32 = arith.constant 0 : i32
    %c0_i32_0 = arith.constant 0 : i32
    %c0_i32_1 = arith.constant 0 : i32
    %c0_i32_2 = arith.constant 0 : i32
    return %arg0, %c0_i32, %c0_i32_0, %c0_i32_1 : i32, i32, i32, i32
  }
}

</mosaic_0001>

<bundles_post_ra>
// kernel: tile.8
= control target key start
LH: loop header
LB: loop body
LE: loop exit
PB: predicated region body
PF: predicated region fallthrough
CT: control target
= control target key end

     0   :  { %s28_s0 = inlined_call_operand.vmem [shape: f32[18], index: 0, kind: input, shape index: {}]   ;;  %s29_s1 = inlined_call_operand.vmem [shape: f32[16,18], index: 1, kind: output, shape index: {}]  }
   0x1   :  { %v4_v0 = vld [vmem:[%s28_s0] ss:$0 sm:$0xff] }
   0x2   :  { %5 = vst [vmem:[%s29_s1] sm:$0xff] %v4_v0  ;;  %8 = vst [vmem:[%s29_s1 + $0x8] sm:$0xff] %v4_v0 }

// kernel: tile.9
= control target key start
LH: loop header
LB: loop body
LE: loop exit
PB: predicated region body
PF: predicated region fallthrough
CT: control target
= control target key end

     0   :  { %vm9_vm0 = vcmask 15360   ;;  %vm22_vm1 = vcmask 31744   ;;  %s173_s14 = smov 126   ;;  %s174_s15 = smov 108   ;;  %vm3_vm2 = vcmask 146432   ;;  %vm13_vm3 = vcmask 130048   ;;  %s261_s0 = inlined_call_operand.vmem [shape: f32[16,18], index: 0, kind: input, shape index: {}]   ;;  %s262_s1 = inlined_call_operand.vmem [shape: f32[1,288], index: 1, kind: output, shape index: {}]  }
   0x1   :  { %v139_v0 = vld [vmem:[%s261_s0 + $0x7] sm:$0x1]   ;;  %v143_v3 = vld [vmem:[%s261_s0 + $0x6] sm:$0x1]   ;;  %v141_v4 = vld [vmem:[%s261_s0 + $0xe] sm:$0x1]  }
   0x2   :  { %v140_v1 = vld [vmem:[%s261_s0 + $0x7] sm:$0x1]   ;;  %34 = vrot.lane.b32.xlu1 %v143_v3, %s174_s15  ;;  %v142_v5 = vld [vmem:[%s261_s0 + $0xe] sm:$0x1]   ;;  %v144_v7 = vld [vmem:[%s261_s0 + $0xd] sm:$0x1]  }
   0x3   :  { %v10_v2 = vsel %vm9_vm0, %v140_v1, %v139_v0  ;;  %v23_v6 = vsel %vm22_vm1, %v142_v5, %v141_v4  ;;  %s175_s20 = smov 124   ;;  %s176_s21 = smov 106   ;;  %v145_v8 = vld [vmem:[%s261_s0 + $0x5] sm:$0x1]   ;;  %v146_v9 = vld [vmem:[%s261_s0 + $0xc] sm:$0x1]  }
   0x4   :  { %11 = vrot.lane.b32.xlu0 %v10_v2, %s173_s14  ;;  %v2_v10 = vld [vmem:[%s261_s0] sm:$0x1]   ;;  %s177_s28 = smov 90   ;;  %s178_s29 = smov 88   ;;  %v147_v11 = vld [vmem:[%s261_s0 + $0x4] sm:$0x1]  }
   0x5   :  { %4 = vst.msk [vmem:[#allocation0] sm:$0x1] %vm3_vm2, %v2_v10   ;;  %v148_v12 = vld [vmem:[%s261_s0 + $0xb] sm:$0x1]   ;;  %s179_s5 = smov 72   ;;  %s180_s6 = smov 70  }
   0x6   :  { %40 = vrot.lane.b32.xlu1 %v144_v7, %s176_s21  ;;  %v149_v13 = vld [vmem:[%s261_s0 + $0x3] sm:$0x1]   ;;  %v150_v14 = vld [vmem:[%s261_s0 + $0xa] sm:$0x1]   ;;  %s181_s11 = smov 54   ;;  %s182_s12 = smov 52  }
   0x7   :  { %v151_v15 = vld [vmem:[%s261_s0 + $0x2] sm:$0x1]   ;;  %v152_v16 = vld [vmem:[%s261_s0 + $0x9] sm:$0x1]   ;;  %s183_s17 = smov 36   ;;  %s184_s18 = smov 34  }
   0x8   :  { %24 = vrot.lane.b32.xlu0 %v23_v6, %s175_s20  ;;  %v153_v17 = vld [vmem:[%s261_s0 + $0x1] sm:$0x1]   ;;  %v154_v18 = vld [vmem:[%s261_s0 + $0x8] sm:$0x1]   ;;  %s185_s23 = smov 18   ;;  %s186_s24 = smov 16  }
   0x9   :  { %v155_v19 = vld [vmem:[%s261_s0 + $0xf] sm:$0x1]   ;;  %s187_s0 = smov 14   ;;  %vm16_vm4 = vcmask 1048560   ;;  %vm36_vm5 = vcmask 1032032   ;;  %vm26_vm6 = vcmask 113664  }
   0xa   :  { %53 = vrot.lane.b32.xlu1 %v146_v9, %s178_s29  ;;  %vm29_vm7 = vcmask 1048544   ;;  %vm42_vm8 = vcmask 1015632   ;;  %vm49_vm9 = vcmask 884432   ;;  %vm55_vm10 = vcmask 868032  }
   0xb   :  { %vm62_vm11 = vcmask 736832   ;;  %vm68_vm12 = vcmask 720432   ;;  %vm75_vm13 = vcmask 589232   ;;  %vm81_vm14 = vcmask 572832  }
   0xc   :  { %47 = vrot.lane.b32.xlu0 %v145_v8, %s177_s28  ;;  %vm88_vm15 = vcmask 441632   ;;  %vm94_vm0 = vcmask 425232   ;;  %vm101_vm1 = vcmask 294032   ;;  %vm107_vm2 = vcmask 277632  }
   0xe   :  { %66 = vrot.lane.b32.xlu1 %v148_v12, %s180_s6 }
  0x10   :  { %60 = vrot.lane.b32.xlu0 %v147_v11, %s179_s5 }
  0x12   :  { %79 = vrot.lane.b32.xlu1 %v150_v14, %s182_s12 }
  0x14   :  { %73 = vrot.lane.b32.xlu0 %v149_v13, %s181_s11 }
  0x16   :  { %92 = vrot.lane.b32.xlu1 %v152_v16, %s184_s18 }
  0x18   :  { %86 = vrot.lane.b32.xlu0 %v151_v15, %s183_s17 }
  0x1a   :  { %105 = vrot.lane.b32.xlu1 %v154_v18, %s186_s24 }
  0x1c   :  { %99 = vrot.lane.b32.xlu0 %v153_v17, %s185_s23 }
  0x20   :  { %112 = vrot.lane.b32.xlu0 %v155_v19, %s187_s0 }
  0x74   :  { %v35_v21 = vpop.permute.xlu1 %34  }
  0x76   :  { %v12_v20 = vpop.permute.xlu0 %11  }
  0x77   :  { %15 = vst.msk [vmem:[#allocation0 + $0x8] sm:$0x1] %vm13_vm3, %v12_v20   ;;  %vm114_vm3 = vcmask 261232  }
  0x78   :  { %17 = vst.msk [vmem:[#allocation0] sm:$0x1] %vm16_vm4, %v12_v20   ;;  %v41_v23 = vpop.permute.xlu1 %40  }
  0x79   :  { %37 = vst.msk [vmem:[#allocation0] sm:$0x1] %vm36_vm5, %v35_v21  }
  0x7a   :  { %v25_v22 = vpop.permute.xlu0 %24  }
  0x7b   :  { %28 = vst.msk [vmem:[#allocation0 + $0x10] sm:$0x1] %vm26_vm6, %v25_v22  }
  0x7c   :  { %31 = vst.msk [vmem:[#allocation0 + $0x8] sm:$0x1] %vm29_vm7, %v25_v22   ;;  %v54_v25 = vpop.permute.xlu1 %53  }
  0x7d   :  { %44 = vst.msk [vmem:[#allocation0 + $0x8] sm:$0x1] %vm42_vm8, %v41_v23  }
  0x7e   :  { %v48_v24 = vpop.permute.xlu0 %47   ;;  %57 = vst.msk [vmem:[#allocation0 + $0x8] sm:$0x1] %vm55_vm10, %v54_v25  }
  0x7f   :  { %50 = vst.msk [vmem:[#allocation0] sm:$0x1] %vm49_vm9, %v48_v24  }
  0x80   :  { %v67_v27 = vpop.permute.xlu1 %66  }
  0x81   :  { %70 = vst.msk [vmem:[#allocation0 + $0x8] sm:$0x1] %vm68_vm12, %v67_v27  }
  0x82   :  { %v61_v26 = vpop.permute.xlu0 %60  }
  0x83   :  { %63 = vst.msk [vmem:[#allocation0] sm:$0x1] %vm62_vm11, %v61_v26  }
  0x84   :  { %v80_v29 = vpop.permute.xlu1 %79  }
  0x85   :  { %83 = vst.msk [vmem:[#allocation0 + $0x8] sm:$0x1] %vm81_vm14, %v80_v29  }
  0x86   :  { %v74_v28 = vpop.permute.xlu0 %73  }
  0x87   :  { %76 = vst.msk [vmem:[#allocation0] sm:$0x1] %vm75_vm13, %v74_v28  }
  0x88   :  { %v93_v31 = vpop.permute.xlu1 %92  }
  0x89   :  { %96 = vst.msk [vmem:[#allocation0 + $0x8] sm:$0x1] %vm94_vm0, %v93_v31  }
  0x8a   :  { %v87_v30 = vpop.permute.xlu0 %86  }
  0x8b   :  { %89 = vst.msk [vmem:[#allocation0] sm:$0x1] %vm88_vm15, %v87_v30  }
  0x8c   :  { %v106_v33 = vpop.permute.xlu1 %105  }
  0x8d   :  { %109 = vst.msk [vmem:[#allocation0 + $0x8] sm:$0x1] %vm107_vm2, %v106_v33  }
  0x8e   :  { %v100_v32 = vpop.permute.xlu0 %99  }
  0x8f   :  { %102 = vst.msk [vmem:[#allocation0] sm:$0x1] %vm101_vm1, %v100_v32  }
  0x92   :  { %v113_v34 = vpop.permute.xlu0 %112  }
  0x93   :  { %116 = vst.msk [vmem:[#allocation0 + $0x10] sm:$0x1] %vm114_vm3, %v113_v34  }
  0x94   :  { %v126_v36 = vld [vmem:[#allocation0 + $0x8] sm:$0x1] }
  0x95   :  { %156 = vst [vmem:[%s262_s1 + $0x1] sm:$0x1] %v126_v36 }
  0x96   :  { %v121_v35 = vld [vmem:[#allocation0] sm:$0x1] }
  0x97   :  { %124 = vst [vmem:[%s262_s1] sm:$0x1] %v121_v35 }
  0x9a   :  { %v132_v37 = vld [vmem:[#allocation0 + $0x10] sm:$0x1] }
  0x9b   :  { %157 = vst [vmem:[%s262_s1 + $0x2] sm:$0x1] %v132_v37 }

// kernel: upsampling_forward.1
= control target key start
LH: loop header
LB: loop body
LE: loop exit
PB: predicated region body
PF: predicated region fallthrough
CT: control target
= control target key end

     0   :  { %s3299_s18 = smov 0   ;;  %s3697_s0 = inlined_call_operand.vmem [shape: f32[2,4,342], index: 0, kind: input, shape index: {}]   ;;  %s3698_s1 = inlined_call_operand.vmem [shape: f32[4,4,8,4], index: 1, kind: input, shape index: {}]   ;;  %s3699_s2 = inlined_call_operand.vmem [shape: f32[8,1], index: 2, kind: input, shape index: {}]   ;;  %s3700_s3 = inlined_call_operand.vmem [shape: f32[8,1], index: 3, kind: input, shape index: {}]   ;;  %s3701_s4 = inlined_call_operand.vmem [shape: f32[1,288], index: 4, kind: input, shape index: {}]   ;;  %s3702_s5 = inlined_call_operand.vmem [shape: f32[2,4,8,288], index: 5, kind: output, shape index: {}]  }
   0x1 LB: > { %s2999_s19 = sadd.s32 4294967295, %s3256_s18   ;;  %p3003_p0 = scmp.ge.s32.totalorder %s3256_s18, 1  ;;  %s3256_s18 = sphi %s3299_s18, %s15_s18  }
   0x2   : > { %p187_p1 = scmp.lt.s32.totalorder %s3256_s18, 3 }
   0x4   : > { %p188_p2 = pnand %p3003_p0, %p187_p1 }
   0x5   : > { %p215_p3 = scmp.lt.s32.totalorder (!%p188_p2), %s2999_s19, 1  ;;  %s3260_s24 = smov (!%p188_p2), 127  }
   0x6   : > { %191 = sbr.rel (%p188_p2) target bundleno = 861 (0x35d), region = 40  ;;  %s3261_s25 = smov (!%p188_p2), 110  }
   0x7   : > { %s3262_s26 = smov (!%p188_p2), 109   ;;  %s3263_s27 = smov (!%p188_p2), 126  }
   0x8   : > { %s3264_s28 = smov (!%p188_p2), 108   ;;  %s3265_s29 = smov (!%p188_p2), 92  }
   0x9   : > { %s3266_s30 = smov (!%p188_p2), 91   ;;  %s3267_s6 = smov (!%p188_p2), 90  }
   0xb   : > { %v3258_v0 = vmov 0.0   ;;  %vm3259_vm0 = vmmov 0   ;;  %s3704_s19 = smov (!%p215_p3, %s2999_s19), 1  ;;  %vm249_vm1 = vcmask 1043456   ;;  %v3006_v4 = vld [vmem:[%s3698_s1 + $0x8] sm:$0xff]  ;;  %vm245_vm2 = vcmask 31744  }
   0xc   : > { %3144 = vmatprep.subr.mxu1 %v3258_v0  ;;  %3146 = vmatprep.mubr.msk.f32.mxu1 %vm3259_vm0, %v3258_v0  ;;  %s3224_s20 = smul.u32 12, %s3704_s19  ;;  %vm242_vm3 = vcmask 1039360   ;;  %v230_v7 = vld [vmem:[%s3698_s1] sm:$0xff]  ;;  %vm555_vm4 = vcmask 900096   ;;  %v3017_v14 = vld [vmem:[%s3698_s1 + $0x10] sm:$0xff]  ;;  %vm719_vm5 = vcmask 891904  }
   0xd   : > { %320 = vmatprep.mubr.f32.mxu0 %v3258_v0  ;;  %v3023_v19 = vld [vmem:[%s3698_s1 + $0x18] sm:$0xff]  ;;  %vm914_vm6 = vcmask 1031168   ;;  %v3030_v24 = vld [vmem:[%s3698_s1 + $0x28] sm:$0xff]  ;;  %v3029_v30 = vld [vmem:[%s3698_s1 + $0x20] sm:$0xff]  ;;  %vm1368_vm7 = vcmask 883712   ;;  %vm1837_vm8 = vcmask 752640  }
   0xe   : > { %s219_s23 = scalar_lea.vmem %s3697_s0, %s3224_s20  ;;  %v3041_v33 = vld [vmem:[%s3698_s1 + $0x30] sm:$0xff]  ;;  %v3047_v37 = vld [vmem:[%s3698_s1 + $0x38] sm:$0xff]  ;;  %v3054_v40 = vld [vmem:[%s3698_s1 + $0x48] sm:$0xff]  ;;  %vm2001_vm9 = vcmask 744448   ;;  %vm2619_vm10 = vcmask 736256   ;;  %vm877_vm11 = vcmask 261120  }
   0xf   : > { %v229_v1 = vld [vmem:[%s219_s23 + $0x8] sm:$0xf]  ;;  %v228_v2 = vld [vmem:[%s219_s23] sm:$0xff]  ;;  %v3065_v46 = vld [vmem:[%s3698_s1 + $0x50] sm:$0xff] }
  0x10   : > { %240 = vrot.lane.b32.xlu0 %v229_v1, %s3260_s24  ;;  %236 = vrot.lane.b32.xlu1 %v228_v2, %s3260_s24  ;;  %v235_v3 = vcombine.high %v228_v2, %v228_v2  ;;  %v3053_v43 = vld [vmem:[%s3698_s1 + $0x40] sm:$0xff]  ;;  %v3071_v50 = vld [vmem:[%s3698_s1 + $0x58] sm:$0xff] }
  0x11   : > { %v3078_v51 = vld [vmem:[%s3698_s1 + $0x68] sm:$0xff]  ;;  %v3077_v53 = vld [vmem:[%s3698_s1 + $0x60] sm:$0xff]  ;;  %v3089_v57 = vld [vmem:[%s3698_s1 + $0x70] sm:$0xff] }
  0x12   : > { %v3095_v59 = vld [vmem:[%s3698_s1 + $0x78] sm:$0xff] }
  0x14   : > { %549 = vrot.lane.b32.xlu1 %v228_v2, %s3261_s25  ;;  %238 = vrot.lane.b32.xlu0 %v235_v3, %s3260_s24  ;;  %s3225_s24 = smul.u32 96, %s3704_s19 }
  0x18   : > { %551 = vrot.lane.b32.xlu1 %v235_v3, %s3261_s25  ;;  %553 = vrot.lane.b32.xlu0 %v229_v1, %s3261_s25 }
  0x1c   : > { %717 = vrot.lane.b32.xlu1 %v229_v1, %s3262_s26  ;;  %715 = vrot.lane.b32.xlu0 %v235_v3, %s3262_s26 }
  0x20   : > { %910 = vrot.lane.b32.xlu1 %v235_v3, %s3263_s27  ;;  %713 = vrot.lane.b32.xlu0 %v228_v2, %s3262_s26  ;;  %s3676_s26 = scalar_lea.vmem %s3702_s5, %s3225_s24 }
  0x24   : > { %908 = vrot.lane.b32.xlu1 %v228_v2, %s3263_s27  ;;  %912 = vrot.lane.b32.xlu0 %v229_v1, %s3263_s27 }
  0x28   : > { %1364 = vrot.lane.b32.xlu0 %v235_v3, %s3264_s28  ;;  %1366 = vrot.lane.b32.xlu1 %v229_v1, %s3264_s28 }
  0x2c   : > { %1362 = vrot.lane.b32.xlu0 %v228_v2, %s3264_s28  ;;  %1833 = vrot.lane.b32.xlu1 %v235_v3, %s3265_s29 }
  0x30   : > { %1835 = vrot.lane.b32.xlu0 %v229_v1, %s3265_s29  ;;  %1831 = vrot.lane.b32.xlu1 %v228_v2, %s3265_s29 }
  0x34   : > { %1997 = vrot.lane.b32.xlu0 %v235_v3, %s3266_s30  ;;  %1999 = vrot.lane.b32.xlu1 %v229_v1, %s3266_s30 }
  0x38   : > { %1995 = vrot.lane.b32.xlu0 %v228_v2, %s3266_s30  ;;  %2615 = vrot.lane.b32.xlu1 %v235_v3, %s3267_s6 }
  0x3c   : > { %2613 = vrot.lane.b32.xlu1 %v228_v2, %s3267_s6  ;;  %2617 = vrot.lane.b32.xlu0 %v229_v1, %s3267_s6 }
  0x82   : > { %v3320_v5 = vpop.permute.xlu0 %240  ;;  %v237_v6 = vpop.permute.xlu1 %236 }
  0x83   : > { %3145 = vmatpush3.msk.msra.mxu1 %vm249_vm1, %v3320_v5 }
  0x84   : > { %3147 = vmatmul.mubr.msk.f32.vlgmr.msra.gmra.mxu1 %vm245_vm2, %v3006_v4  ;;  %3149 = vmatprep.subr.mxu1 %v3258_v0 }
  0x85   : > { %3150 = vmatpush3.msk.msra.mxu1 %vm249_vm1, %v229_v1  ;;  %3151 = vmatprep.mubr.msk.f32.mxu1 %vm3259_vm0, %v3258_v0 }
  0x86   : > { %v550_v8 = vpop.permute.xlu1 %549  ;;  %v239_v9 = vpop.permute.xlu0 %238  ;;  %3154 = vmatprep.subr.mxu1 %v3258_v0 }
  0x87   : > { %v244_v10 = vsel %vm242_vm3, %v239_v9, %v3320_v5  ;;  %v243_v11 = vsel %vm242_vm3, %v237_v6, %v239_v9 }
  0x88   : > { %3007 = vmatprep.subr.msk.mxu0 %vm249_vm1, %v244_v10  ;;  %3152 = vmatmul.mubr.msk.f32.vlgmr.msra.gmra.mxu1 %vm245_vm2, %v230_v7 }
  0x89   : > { %3008 = vmatpush1.msk.msra.mxu0 %vm249_vm1, %v243_v11  ;;  %3156 = vmatprep.mubr.msk.f32.mxu1 %vm3259_vm0, %v3258_v0 }
  0x8a   : > { %v552_v12 = vpop.permute.xlu1 %551  ;;  %3009 = vmatmul.mubr.msk.f32.vlgmr.msra.gmra.mxu0 %vm245_vm2, %v3006_v4  ;;  %3012 = vmatprep.subr.msk.mxu0 %vm249_vm1, %v235_v3  ;;  %v3341_v13 = vpop.permute.xlu0 %553  ;;  %v880_v3 = vlaneseq }
  0x8b   : > { %3013 = vmatpush1.msk.msra.mxu0 %vm249_vm1, %v228_v2  ;;  %3155 = vmatpush3.msk.msra.mxu1 %vm249_vm1, %v3341_v13  ;;  %v3351_v15 = vsel %vm555_vm4, %v552_v12, %v3341_v13  ;;  %v3359_v16 = vsel %vm555_vm4, %v550_v8, %v552_v12 }
  0x8c   : > { %3018 = vmatprep.subr.msk.mxu0 %vm249_vm1, %v3351_v15  ;;  %470 = vmatprep.mubr.f32.mxu0 %v3258_v0  ;;  %v881_v8 = vshrl.u32 %v880_v3, 7 }
  0x8d   : > { %3159 = vmatprep.subr.mxu1 %v3258_v0  ;;  %3157 = vmatmul.mubr.msk.f32.vlgmr.msra.gmra.mxu1 %vm245_vm2, %v3017_v14 }
  0x8e   : > { %v3361_v17 = vpop.permute.xlu1 %717  ;;  %3014 = vmatmul.mubr.msk.f32.vlgmr.msra.gmra.mxu0 %vm245_vm2, %v230_v7  ;;  %v716_v18 = vpop.permute.xlu0 %715  ;;  %3161 = vmatprep.mubr.msk.f32.mxu1 %vm3259_vm0, %v3258_v0 }
  0x8f   : > { %3019 = vmatpush1.msk.msra.mxu0 %vm249_vm1, %v3359_v16  ;;  %v3373_v20 = vsel %vm719_vm5, %v716_v18, %v3361_v17  ;;  %3160 = vmatpush3.msk.msra.mxu1 %vm249_vm1, %v3361_v17 }
  0x90   : > { %3024 = vmatprep.subr.msk.mxu0 %vm249_vm1, %v3373_v20  ;;  %631 = vmatprep.mubr.f32.mxu0 %v3258_v0 }
  0x91   : > { %3162 = vmatmul.mubr.msk.f32.vlgmr.msra.gmra.mxu1 %vm245_vm2, %v3023_v19  ;;  %3164 = vmatprep.subr.mxu1 %v3258_v0 }
  0x92   : > { %v911_v21 = vpop.permute.xlu1 %910  ;;  %3020 = vmatmul.mubr.msk.f32.vlgmr.msra.gmra.mxu0 %vm245_vm2, %v3017_v14  ;;  %v714_v22 = vpop.permute.xlu0 %713  ;;  %3166 = vmatprep.mubr.msk.f32.mxu1 %vm3259_vm0, %v3258_v0 }
  0x93   : > { %v3386_v23 = vsel %vm719_vm5, %v714_v22, %v716_v18  ;;  %795 = vmatprep.mubr.f32.mxu0 %v3258_v0  ;;  %v886_v18 = vsub.s32 1, %v881_v8 }
  0x94   : > { %3025 = vmatpush1.msk.msra.mxu0 %vm249_vm1, %v3386_v23 }
  0x96   : > { %v909_v25 = vpop.permute.xlu1 %908  ;;  %3026 = vmatmul.mubr.msk.f32.vlgmr.msra.gmra.mxu0 %vm245_vm2, %v3023_v19  ;;  %v913_v26 = vpop.permute.xlu0 %912 }
  0x97   : > { %v915_v27 = vsel %vm914_vm6, %v909_v25, %v911_v21  ;;  %v916_v28 = vsel %vm914_vm6, %v911_v21, %v913_v26  ;;  %3165 = vmatpush3.msk.msra.mxu1 %vm249_vm1, %v913_v26  ;;  %990 = vmatprep.mubr.f32.mxu0 %v3258_v0 }
  0x98   : > { %3031 = vmatprep.subr.msk.mxu0 %vm249_vm1, %v916_v28  ;;  %3167 = vmatmul.mubr.msk.f32.vlgmr.msra.gmra.mxu1 %vm245_vm2, %v3030_v24 }
  0x99   : > { %3169 = vmatprep.subr.mxu1 %v3258_v0  ;;  %3032 = vmatpush1.msk.msra.mxu0 %vm249_vm1, %v915_v27 }
  0x9a   : > { %3170 = vmatpush3.msk.msra.mxu1 %vm249_vm1, %v3320_v5  ;;  %3033 = vmatmul.mubr.msk.f32.vlgmr.msra.gmra.mxu0 %vm245_vm2, %v3030_v24  ;;  %v1365_v29 = vpop.permute.xlu0 %1364  ;;  %v3410_v31 = vpop.permute.xlu1 %1366 }
  0x9b   : > { %3036 = vmatprep.subr.msk.mxu0 %vm249_vm1, %v244_v10  ;;  %3171 = vmatprep.mubr.msk.f32.mxu1 %vm3259_vm0, %v3258_v0  ;;  %v3424_v34 = vsel %vm1368_vm7, %v1365_v29, %v3410_v31 }
  0x9c   : > { %3037 = vmatpush1.msk.msra.mxu0 %vm249_vm1, %v243_v11  ;;  %3174 = vmatprep.subr.mxu1 %v3258_v0 }
  0x9d   : > { %3172 = vmatmul.mubr.msk.f32.vlgmr.msra.gmra.mxu1 %vm245_vm2, %v3029_v30  ;;  %3042 = vmatprep.subr.msk.mxu0 %vm249_vm1, %v3373_v20 }
  0x9e   : > { %3175 = vmatpush3.msk.msra.mxu1 %vm249_vm1, %v3361_v17  ;;  %1134 = vmatprep.mubr.f32.mxu0 %v3258_v0  ;;  %v1363_v32 = vpop.permute.xlu0 %1362  ;;  %v1834_v35 = vpop.permute.xlu1 %1833 }
  0x9f   : > { %3038 = vmatmul.mubr.msk.f32.vlgmr.msra.gmra.mxu0 %vm245_vm2, %v3029_v30  ;;  %3176 = vmatprep.mubr.msk.f32.mxu1 %vm3259_vm0, %v3258_v0  ;;  %v3432_v36 = vsel %vm1368_vm7, %v1363_v32, %v1365_v29 }
  0xa0   : > { %3043 = vmatpush1.msk.msra.mxu0 %vm249_vm1, %v3386_v23  ;;  %1280 = vmatprep.mubr.f32.mxu0 %v3258_v0 }
  0xa1   : > { %3177 = vmatmul.mubr.msk.f32.vlgmr.msra.gmra.mxu1 %vm245_vm2, %v3041_v33  ;;  %3048 = vmatprep.subr.msk.mxu0 %vm249_vm1, %v3424_v34 }
  0xa2   : > { %3179 = vmatprep.subr.mxu1 %v3258_v0  ;;  %3181 = vmatprep.mubr.msk.f32.mxu1 %vm3259_vm0, %v3258_v0  ;;  %v1836_v38 = vpop.permute.xlu0 %1835  ;;  %v1832_v39 = vpop.permute.xlu1 %1831 }
  0xa3   : > { %3044 = vmatmul.mubr.msk.f32.vlgmr.msra.gmra.mxu0 %vm245_vm2, %v3041_v33  ;;  %3180 = vmatpush3.msk.msra.mxu1 %vm249_vm1, %v3410_v31  ;;  %v1839_v42 = vsel %vm1837_vm8, %v1834_v35, %v1836_v38  ;;  %v1838_v48 = vsel %vm1837_vm8, %v1832_v39, %v1834_v35 }
  0xa4   : > { %3049 = vmatpush1.msk.msra.mxu0 %vm249_vm1, %v3432_v36  ;;  %3184 = vmatprep.subr.mxu1 %v3258_v0 }
  0xa5   : > { %3055 = vmatprep.subr.msk.mxu0 %vm249_vm1, %v3373_v20  ;;  %3182 = vmatmul.mubr.msk.f32.vlgmr.msra.gmra.mxu1 %vm245_vm2, %v3047_v37 }
  0xa6   : > { %3185 = vmatpush3.msk.msra.mxu1 %vm249_vm1, %v3361_v17  ;;  %1444 = vmatprep.mubr.f32.mxu0 %v3258_v0  ;;  %v1998_v41 = vpop.permute.xlu0 %1997  ;;  %v2000_v44 = vpop.permute.xlu1 %1999 }
  0xa7   : > { %3050 = vmatmul.mubr.msk.f32.vlgmr.msra.gmra.mxu0 %vm245_vm2, %v3047_v37  ;;  %3186 = vmatprep.mubr.msk.f32.mxu1 %vm3259_vm0, %v3258_v0  ;;  %v2003_v47 = vsel %vm2001_vm9, %v1998_v41, %v2000_v44 }
  0xa8   : > { %3056 = vmatpush1.msk.msra.mxu0 %vm249_vm1, %v3386_v23  ;;  %3189 = vmatprep.subr.mxu1 %v3258_v0 }
  0xa9   : > { %3060 = vmatprep.subr.msk.mxu0 %vm249_vm1, %v3351_v15  ;;  %3187 = vmatmul.mubr.msk.f32.vlgmr.msra.gmra.mxu1 %vm245_vm2, %v3054_v40  ;;  %v225_v15 = vld [vmem:[%s3701_s4] sm:$0x7] }
  0xaa   : > { %3190 = vmatpush3.msk.msra.mxu1 %vm249_vm1, %v3341_v13  ;;  %1608 = vmatprep.mubr.f32.mxu0 %v3258_v0  ;;  %v1996_v45 = vpop.permute.xlu0 %1995  ;;  %v2616_v52 = vpop.permute.xlu1 %2615  ;;  %v890_v13 = vsub.s32 2, %v881_v8  ;;  %v3571_v27 = vrot.slane %v225_v15, %v886_v18 }
  0xab   : > { %3057 = vmatmul.mubr.msk.f32.vlgmr.msra.gmra.mxu0 %vm245_vm2, %v3054_v40  ;;  %3191 = vmatprep.mubr.msk.f32.mxu1 %vm3259_vm0, %v3258_v0  ;;  %v2002_v49 = vsel %vm2001_vm9, %v1996_v45, %v1998_v41 }
  0xac   : > { %3061 = vmatpush1.msk.msra.mxu0 %vm249_vm1, %v3359_v16  ;;  %3194 = vmatprep.subr.mxu1 %v3258_v0  ;;  %v882_v16 = vsub.s32 0, %v881_v8  ;;  %v3565_v22 = vrot.slane %v225_v15, %v890_v13 }
  0xad   : > { %3192 = vmatmul.mubr.msk.f32.vlgmr.msra.gmra.mxu1 %vm245_vm2, %v3053_v43  ;;  %3066 = vmatprep.subr.msk.mxu0 %vm249_vm1, %v1839_v42 }
  0xae   : > { %3195 = vmatpush3.msk.msra.mxu1 %vm249_vm1, %v1836_v38  ;;  %1752 = vmatprep.mubr.f32.mxu0 %v3258_v0  ;;  %v2618_v54 = vpop.permute.xlu0 %2617  ;;  %v2614_v55 = vpop.permute.xlu1 %2613  ;;  %v3569_v26 = vrot.slane %v225_v15, %v882_v16 }
  0xaf   : > { %3062 = vmatmul.mubr.msk.f32.vlgmr.msra.gmra.mxu0 %vm245_vm2, %v3053_v43  ;;  %3196 = vmatprep.mubr.msk.f32.mxu1 %vm3259_vm0, %v3258_v0  ;;  %v2621_v56 = vsel %vm2619_vm10, %v2616_v52, %v2618_v54  ;;  %v2620_v58 = vsel %vm2619_vm10, %v2614_v55, %v2616_v52 }
  0xb0   : > { %3067 = vmatpush1.msk.msra.mxu0 %vm249_vm1, %v1838_v48  ;;  %1913 = vmatprep.mubr.f32.mxu0 %v3258_v0 }
  0xb1   : > { %3197 = vmatmul.mubr.msk.f32.vlgmr.msra.gmra.mxu1 %vm245_vm2, %v3065_v46  ;;  %3072 = vmatprep.subr.msk.mxu0 %vm249_vm1, %v2003_v47 }
  0xb2   : > { %3199 = vmatprep.subr.mxu1 %v3258_v0  ;;  %3201 = vmatprep.mubr.msk.f32.mxu1 %vm3259_vm0, %v3258_v0 }
  0xb3   : > { %3068 = vmatmul.mubr.msk.f32.vlgmr.msra.gmra.mxu0 %vm245_vm2, %v3065_v46  ;;  %3200 = vmatpush3.msk.msra.mxu1 %vm249_vm1, %v2000_v44 }
  0xb4   : > { %3073 = vmatpush1.msk.msra.mxu0 %vm249_vm1, %v2002_v49  ;;  %3204 = vmatprep.subr.mxu1 %v3258_v0 }
  0xb5   : > { %3079 = vmatprep.subr.msk.mxu0 %vm249_vm1, %v3424_v34  ;;  %3202 = vmatmul.mubr.msk.f32.vlgmr.msra.gmra.mxu1 %vm245_vm2, %v3071_v50 }
  0xb6   : > { %3205 = vmatpush3.msk.msra.mxu1 %vm249_vm1, %v3410_v31  ;;  %2077 = vmatprep.mubr.f32.mxu0 %v3258_v0 }
  0xb7   : > { %3074 = vmatmul.mubr.msk.f32.vlgmr.msra.gmra.mxu0 %vm245_vm2, %v3071_v50  ;;  %3206 = vmatprep.mubr.msk.f32.mxu1 %vm3259_vm0, %v3258_v0 }
  0xb8   : > { %3080 = vmatpush1.msk.msra.mxu0 %vm249_vm1, %v3432_v36  ;;  %3209 = vmatprep.subr.mxu1 %v3258_v0 }
  0xb9   : > { %3084 = vmatprep.subr.msk.mxu0 %vm249_vm1, %v3373_v20  ;;  %3207 = vmatmul.mubr.msk.f32.vlgmr.msra.gmra.mxu1 %vm245_vm2, %v3078_v51 }
  0xba   : > { %3210 = vmatpush3.msk.msra.mxu1 %vm249_vm1, %v3361_v17  ;;  %2241 = vmatprep.mubr.f32.mxu0 %v3258_v0 }
  0xbb   : > { %3081 = vmatmul.mubr.msk.f32.vlgmr.msra.gmra.mxu0 %vm245_vm2, %v3078_v51  ;;  %3211 = vmatprep.mubr.msk.f32.mxu1 %vm3259_vm0, %v3258_v0 }
  0xbc   : > { %3085 = vmatpush1.msk.msra.mxu0 %vm249_vm1, %v3386_v23  ;;  %3214 = vmatprep.subr.mxu1 %v3258_v0 }
  0xbd   : > { %3090 = vmatprep.subr.msk.mxu0 %vm249_vm1, %v2003_v47  ;;  %3212 = vmatmul.mubr.msk.f32.vlgmr.msra.gmra.mxu1 %vm245_vm2, %v3077_v53 }
  0xbe   : > { %3215 = vmatpush3.msk.msra.mxu1 %vm249_vm1, %v2000_v44  ;;  %2385 = vmatprep.mubr.f32.mxu0 %v3258_v0 }
  0xbf   : > { %3086 = vmatmul.mubr.msk.f32.vlgmr.msra.gmra.mxu0 %vm245_vm2, %v3077_v53  ;;  %3216 = vmatprep.mubr.msk.f32.mxu1 %vm3259_vm0, %v3258_v0 }
  0xc0   : > { %3091 = vmatpush1.msk.msra.mxu0 %vm249_vm1, %v2002_v49  ;;  %2531 = vmatprep.mubr.f32.mxu0 %v3258_v0 }
  0xc1   : > { %3217 = vmatmul.mubr.msk.f32.vlgmr.msra.gmra.mxu1 %vm245_vm2, %v3089_v57  ;;  %3096 = vmatprep.subr.msk.mxu0 %vm249_vm1, %v2621_v56 }
  0xc2   : > { %3219 = vmatprep.subr.mxu1 %v3258_v0  ;;  %3221 = vmatprep.mubr.msk.f32.mxu1 %vm3259_vm0, %v3258_v0 }
  0xc3   : > { %3092 = vmatmul.mubr.msk.f32.vlgmr.msra.gmra.mxu0 %vm245_vm2, %v3089_v57  ;;  %3220 = vmatpush3.msk.msra.mxu1 %vm249_vm1, %v2618_v54 }
  0xc4   : > { %3097 = vmatpush1.msk.msra.mxu0 %vm249_vm1, %v2620_v58  ;;  %2695 = vmatprep.mubr.f32.mxu0 %v3258_v0 }
  0xc5   : > { %3222 = vmatmul.mubr.msk.f32.vlgmr.msra.gmra.mxu1 %vm245_vm2, %v3095_v59 }
  0xc7   : > { %3098 = vmatmul.mubr.msk.f32.vlgmr.msra.gmra.mxu0 %vm245_vm2, %v3095_v59 }
 0x144   : > { %v393_v60 = vpop.f32.mrf.mxu1 }
 0x146   : > { %v3148_v61 = vpop.f32.mrf.mxu1 }
 0x148   : > { %v543_v62 = vpop.f32.mrf.mxu1 }
 0x149   : > { %v544_v1 = vadd.f32 %v543_v62, %v393_v60 }
 0x14a   : > { %v322_v63 = vpop.f32.mrf.mxu0  ;;  %v3153_v2 = vpop.f32.mrf.mxu1 }
 0x14c   : > { %v324_v4 = vpop.f32.mrf.mxu0 }
 0x14d   : > { %v704_v5 = vpop.f32.mrf.mxu1 }
 0x14e   : > { %v472_v6 = vpop.f32.mrf.mxu0  ;;  %v710_v7 = vadd.f32 %v704_v5, %v544_v1 }
 0x14f   : > { %v3158_v9 = vpop.f32.mrf.mxu1  ;;  %v473_v14 = vadd.f32 %v472_v6, %v322_v63 }
 0x150   : > { %v474_v10 = vpop.f32.mrf.mxu0 }
 0x151   : > { %v868_v11 = vpop.f32.mrf.mxu1  ;;  %v475_v20 = vadd.f32 %v474_v10, %v324_v4 }
 0x152   : > { %v633_v0 = vpop.f32.mrf.mxu0  ;;  %v874_v12 = vadd.f32 %v868_v11, %v710_v7 }
 0x153   : > { %v3163_v17 = vpop.f32.mrf.mxu1  ;;  %v708_v21 = vadd.f32 %v633_v0, %v473_v14 }
 0x154   : > { %v635_v19 = vpop.f32.mrf.mxu0  ;;  %878 = vst.msk [vmem:[#allocation2 + $0x10] sm:$0xff] %vm877_vm11, %v874_v12  ;;  %v897_v31 = vmul.f32 %v3565_v22, %v874_v12 }
 0x155   : > { %v709_v24 = vadd.f32 %v635_v19, %v475_v20 }
 0x156   : > { %v797_v23 = vpop.f32.mrf.mxu0  ;;  %v899_v39 = vsel %vm877_vm11, %v897_v31, 0.0 }
 0x157   : > { %v3567_v25 = vadd.f32 %v797_v23, %v708_v21 }
 0x158   : > { %v799_v28 = vpop.f32.mrf.mxu0  ;;  %v1063_v29 = vpop.f32.mrf.mxu1 }
 0x159   : > { %v3573_v30 = vadd.f32 %v799_v28, %v709_v24  ;;  %v895_v34 = vmul.f32 %v3569_v26, %v3567_v25 }
 0x15a   : > { %v992_v32 = vpop.f32.mrf.mxu0  ;;  %v3168_v33 = vpop.f32.mrf.mxu1 }
 0x15b   : > { %v896_v35 = vmul.f32 %v3571_v27, %v3573_v30 }
 0x15c   : > { %v994_v36 = vpop.f32.mrf.mxu0 }
 0x15d   : > { %v1207_v37 = vpop.f32.mrf.mxu1  ;;  %v898_v38 = vadd.f32 %v896_v35, %v895_v34 }
 0x15e   : > { %v1208_v43 = vadd.f32 %v1207_v37, %v1063_v29 }
 0x15f   : > { %v1136_v40 = vpop.f32.mrf.mxu0  ;;  %v3173_v41 = vpop.f32.mrf.mxu1  ;;  %v900_v42 = vadd.f32 %v899_v39, %v898_v38 }
 0x160   : > { %v1137_v48 = vadd.f32 %v1136_v40, %v992_v32 }
 0x161   : > { %v1138_v44 = vpop.f32.mrf.mxu0  ;;  %v1353_v45 = vpop.f32.mrf.mxu1  ;;  %901 = vadd.xlane.f32.xlu0 %v900_v42 }
 0x162   : > { %v1359_v49 = vadd.f32 %v1353_v45, %v1208_v43  ;;  %v1139_v52 = vadd.f32 %v1138_v44, %v994_v36 }
 0x163   : > { %v1282_v46 = vpop.f32.mrf.mxu0  ;;  %v3178_v47 = vpop.f32.mrf.mxu1 }
 0x164   : > { %v1357_v53 = vadd.f32 %v1282_v46, %v1137_v48 }
 0x165   : > { %v1284_v50 = vpop.f32.mrf.mxu0  ;;  %v1517_v51 = vpop.f32.mrf.mxu1 }
 0x166   : > { %v1523_v54 = vadd.f32 %v1517_v51, %v1359_v49  ;;  %v1358_v57 = vadd.f32 %v1284_v50, %v1139_v52 }
 0x167   : > { %v1446_v55 = vpop.f32.mrf.mxu0  ;;  %v3183_v56 = vpop.f32.mrf.mxu1 }
 0x168   : > { %1527 = vst.msk [vmem:[#allocation2 + $0x28] sm:$0xff] %vm877_vm11, %v1523_v54  ;;  %v3582_v58 = vadd.f32 %v1446_v55, %v1357_v53  ;;  %v1530_v62 = vmul.f32 %v1523_v54, %v3565_v22 }
 0x169   : > { %v1448_v59 = vpop.f32.mrf.mxu0  ;;  %v1681_v60 = vpop.f32.mrf.mxu1 }
 0x16a   : > { %v3584_v61 = vadd.f32 %v1448_v59, %v1358_v57  ;;  %v1528_v2 = vmul.f32 %v3582_v58, %v3569_v26  ;;  %v1532_v9 = vsel %vm877_vm11, %v1530_v62, 0.0 }
 0x16b   : > { %v1610_v63 = vpop.f32.mrf.mxu0  ;;  %v3188_v1 = vpop.f32.mrf.mxu1 }
 0x16c   : > { %v1529_v3 = vmul.f32 %v3584_v61, %v3571_v27 }
 0x16d   : > { %v1612_v4 = vpop.f32.mrf.mxu0  ;;  %v1825_v5 = vpop.f32.mrf.mxu1 }
 0x16e   : > { %v1531_v6 = vadd.f32 %v1529_v3, %v1528_v2  ;;  %v1826_v10 = vadd.f32 %v1825_v5, %v1681_v60 }
 0x16f   : > { %v1754_v7 = vpop.f32.mrf.mxu0  ;;  %v3193_v8 = vpop.f32.mrf.mxu1 }
 0x170   : > { %v1533_v11 = vadd.f32 %v1532_v9, %v1531_v6  ;;  %v1755_v15 = vadd.f32 %v1754_v7, %v1610_v63 }
 0x171   : > { %v1756_v0 = vpop.f32.mrf.mxu0  ;;  %v1986_v12 = vpop.f32.mrf.mxu1 }
 0x172   : > { %1534 = vadd.xlane.f32.xlu1 %v1533_v11  ;;  %v1992_v16 = vadd.f32 %v1986_v12, %v1826_v10  ;;  %v1757_v19 = vadd.f32 %v1756_v0, %v1612_v4 }
 0x173   : > { %v1915_v13 = vpop.f32.mrf.mxu0  ;;  %v3198_v14 = vpop.f32.mrf.mxu1 }
 0x174   : > { %v1990_v20 = vadd.f32 %v1915_v13, %v1755_v15 }
 0x175   : > { %v1917_v17 = vpop.f32.mrf.mxu0  ;;  %v2150_v18 = vpop.f32.mrf.mxu1 }
 0x176   : > { %v2156_v21 = vadd.f32 %v2150_v18, %v1992_v16  ;;  %v1991_v28 = vadd.f32 %v1917_v17, %v1757_v19  ;;  %v2889_v16 = vld [vmem:[#allocation2 + $0x28] sm:$0xff] }
 0x177   : > { %v2079_v23 = vpop.f32.mrf.mxu0  ;;  %v3203_v24 = vpop.f32.mrf.mxu1 }
 0x178   : > { %2160 = vst.msk [vmem:[#allocation2 + $0x40] sm:$0xff] %vm877_vm11, %v2156_v21  ;;  %v3593_v29 = vadd.f32 %v2079_v23, %v1990_v20  ;;  %v2163_v34 = vmul.f32 %v2156_v21, %v3565_v22  ;;  %v2791_v20 = vld [vmem:[#allocation2 + $0x10] sm:$0xff] }
 0x179   : > { %v2081_v31 = vpop.f32.mrf.mxu0  ;;  %v2314_v32 = vpop.f32.mrf.mxu1 }
 0x17a   : > { %v3595_v33 = vadd.f32 %v2081_v31, %v1991_v28  ;;  %v2161_v37 = vmul.f32 %v3593_v29, %v3569_v26  ;;  %v2165_v44 = vsel %vm877_vm11, %v2163_v34, 0.0 }
 0x17b   : > { %v2243_v35 = vpop.f32.mrf.mxu0  ;;  %v3208_v36 = vpop.f32.mrf.mxu1 }
 0x17c   : > { %v2162_v38 = vmul.f32 %v3595_v33, %v3571_v27 }
 0x17d   : > { %v2245_v39 = vpop.f32.mrf.mxu0  ;;  %v2458_v40 = vpop.f32.mrf.mxu1 }
 0x17e   : > { %v2164_v41 = vadd.f32 %v2162_v38, %v2161_v37  ;;  %v2459_v45 = vadd.f32 %v2458_v40, %v2314_v32 }
 0x17f   : > { %v2387_v42 = vpop.f32.mrf.mxu0  ;;  %v3213_v43 = vpop.f32.mrf.mxu1 }
 0x180   : > { %v2166_v46 = vadd.f32 %v2165_v44, %v2164_v41  ;;  %v2388_v51 = vadd.f32 %v2387_v42, %v2243_v35 }
 0x181   : > { %v2389_v47 = vpop.f32.mrf.mxu0  ;;  %v2604_v48 = vpop.f32.mrf.mxu1 }
 0x182   : > { %2167 = vadd.xlane.f32.xlu0 %v2166_v46  ;;  %v2610_v52 = vadd.f32 %v2604_v48, %v2459_v45  ;;  %v2390_v55 = vadd.f32 %v2389_v47, %v2245_v39 }
 0x183   : > { %v2533_v49 = vpop.f32.mrf.mxu0  ;;  %v3218_v50 = vpop.f32.mrf.mxu1 }
 0x184   : > { %v2608_v56 = vadd.f32 %v2533_v49, %v2388_v51  ;;  %v2908_v50 = vld [vmem:[#allocation2 + $0x40] sm:$0xff] }
 0x185   : > { %v2535_v53 = vpop.f32.mrf.mxu0  ;;  %v2768_v54 = vpop.f32.mrf.mxu1 }
 0x186   : > { %v2774_v57 = vadd.f32 %v2768_v54, %v2610_v52  ;;  %v2609_v62 = vadd.f32 %v2535_v53, %v2390_v55 }
 0x187   : > { %v2697_v59 = vpop.f32.mrf.mxu0  ;;  %v3223_v60 = vpop.f32.mrf.mxu1 }
 0x188   : > { %2778 = vst.msk [vmem:[#allocation2 + $0x58] sm:$0xff] %vm877_vm11, %v2774_v57  ;;  %v2772_v63 = vadd.f32 %v2697_v59, %v2608_v56  ;;  %v2781_v3 = vmul.f32 %v2774_v57, %v3565_v22 }
 0x189   : > { %v2699_v1 = vpop.f32.mrf.mxu0 }
 0x18a   : > { %v2773_v2 = vadd.f32 %v2699_v1, %v2609_v62  ;;  %v2779_v4 = vmul.f32 %v2772_v63, %v3569_v26  ;;  %v2783_v7 = vsel %vm877_vm11, %v2781_v3, 0.0 }
 0x18c   : > { %v2780_v5 = vmul.f32 %v2773_v2, %v3571_v27 }
 0x18e   : > { %v2782_v6 = vadd.f32 %v2780_v5, %v2779_v4 }
 0x190   : > { %v2784_v8 = vadd.f32 %v2783_v7, %v2782_v6 }
 0x192   : > { %2785 = vadd.xlane.f32.xlu0 %v2784_v8 }
 0x1ea   : > { %v902_v9 = vpop.xlane.xlu0 %901 }
 0x1fb   : > { %v1535_v10 = vpop.xlane.xlu1 %1534 }
 0x1fc   : > { %v1536_v0 = vadd.f32 %v1535_v10, %v902_v9 }
 0x20b   : > { %v2168_v11 = vpop.xlane.xlu0 %2167 }
 0x20c   : > { %v2169_v12 = vadd.f32 %v2168_v11, %v1536_v0 }
 0x21b   : > { %v2786_v13 = vpop.xlane.xlu0 %2785 }
 0x21c   : > { %v2787_v14 = vadd.f32 %v2786_v13, %v2169_v12 }
 0x21e   : > { %v2788_v15 = vmul.f32 0.0009765625, %v2787_v14 }
 0x220   : > { %v3609_v17 = vsub.f32 %v3582_v58, %v2788_v15  ;;  %v3612_v18 = vsub.f32 %v3584_v61, %v2788_v15  ;;  %v3614_v19 = vsub.f32 %v2889_v16, %v2788_v15  ;;  %v3617_v21 = vsub.f32 %v3567_v25, %v2788_v15  ;;  %v2927_v58 = vld [vmem:[#allocation2 + $0x58] sm:$0xff] }
 0x221   : > { %v3620_v23 = vsub.f32 %v3573_v30, %v2788_v15  ;;  %v3622_v24 = vsub.f32 %v2791_v20, %v2788_v15  ;;  %v3624_v28 = vsub.f32 %v2772_v63, %v2788_v15  ;;  %v3626_v31 = vsub.f32 %v2773_v2, %v2788_v15 }
 0x222   : > { %v2813_v61 = vmul.f32 %v3609_v17, %v3569_v26  ;;  %v2814_v32 = vmul.f32 %v3612_v18, %v3571_v27  ;;  %v2815_v25 = vmul.f32 %v3614_v19, %v3565_v22  ;;  %v2795_v30 = vmul.f32 %v3617_v21, %v3569_v26 }
 0x223   : > { %v2796_v34 = vmul.f32 %v3620_v23, %v3571_v27  ;;  %v2797_v35 = vmul.f32 %v3622_v24, %v3565_v22  ;;  %v3640_v36 = vsub.f32 %v2927_v58, %v2788_v15  ;;  %v2849_v37 = vmul.f32 %v3624_v28, %v3569_v26 }
 0x224   : > { %v2816_v38 = vmul.f32 %v2813_v61, %v2813_v61  ;;  %v2817_v39 = vmul.f32 %v2814_v32, %v2814_v32  ;;  %v2818_v40 = vmul.f32 %v2815_v25, %v2815_v25  ;;  %v2798_v41 = vmul.f32 %v2795_v30, %v2795_v30 }
 0x225   : > { %v2799_v42 = vmul.f32 %v2796_v34, %v2796_v34  ;;  %v2800_v43 = vmul.f32 %v2797_v35, %v2797_v35  ;;  %v2850_v44 = vmul.f32 %v3626_v31, %v3571_v27  ;;  %v2851_v45 = vmul.f32 %v3640_v36, %v3565_v22 }
 0x226   : > { %v2819_v46 = vadd.f32 %v2817_v39, %v2816_v38  ;;  %v2820_v47 = vsel %vm877_vm11, %v2818_v40, 0.0  ;;  %v2852_v48 = vmul.f32 %v2849_v37, %v2849_v37  ;;  %v2828_v49 = vsub.f32 %v3593_v29, %v2788_v15 }
 0x227   : > { %v2801_v51 = vadd.f32 %v2799_v42, %v2798_v41  ;;  %v2802_v52 = vsel %vm877_vm11, %v2800_v43, 0.0  ;;  %v2853_v53 = vmul.f32 %v2850_v44, %v2850_v44  ;;  %v2854_v54 = vmul.f32 %v2851_v45, %v2851_v45 }
 0x228   : > { %v2821_v55 = vadd.f32 %v2820_v47, %v2819_v46  ;;  %v2829_v56 = vsub.f32 %v3595_v33, %v2788_v15  ;;  %v2830_v57 = vsub.f32 %v2908_v50, %v2788_v15  ;;  %v2831_v59 = vmul.f32 %v2828_v49, %v3569_v26  ;;  %v226_v15 = vld [vmem:[%s3699_s2] sm:$0xff] }
 0x229   : > { %v2803_v60 = vadd.f32 %v2802_v52, %v2801_v51  ;;  %v2855_v62 = vadd.f32 %v2853_v53, %v2852_v48  ;;  %v2856_v63 = vsel %vm877_vm11, %v2854_v54, 0.0  ;;  %v3268_v26 = vmov 0  }
 0x22a   : > { %2822 = vadd.xlane.f32.xlu0 %v2821_v55  ;;  %v2832_v1 = vmul.f32 %v2829_v56, %v3571_v27  ;;  %v2833_v29 = vmul.f32 %v2830_v57, %v3565_v22  ;;  %v2834_v2 = vmul.f32 %v2831_v59, %v2831_v59  ;;  %3245 = vset.pattern.permute.xlu1 %v3268_v26  ;;  %v227_v27 = vld [vmem:[%s3700_s3] sm:$0xff] }
 0x22b   : > { %2804 = vadd.xlane.f32.xlu1 %v2803_v60  ;;  %v2857_v3 = vadd.f32 %v2856_v63, %v2855_v62  ;;  %3246 = vset.pattern.permute.xlu0 %v3268_v26 }
 0x22c   : > { %v2835_v4 = vmul.f32 %v2832_v1, %v2832_v1  ;;  %v2836_v5 = vmul.f32 %v2833_v29, %v2833_v29 }
 0x22e   : > { %2858 = vadd.xlane.f32.xlu0 %v2857_v3  ;;  %v2837_v6 = vadd.f32 %v2835_v4, %v2834_v2  ;;  %v2838_v33 = vsel %vm877_vm11, %v2836_v5, 0.0 }
 0x230   : > { %v2839_v7 = vadd.f32 %v2838_v33, %v2837_v6 }
 0x232   : > { %2840 = vadd.xlane.f32.xlu1 %v2839_v7 }
 0x244   : > { %2875 = vperm.xlu0 %3246, %v227_v27  }
 0x2b3   : > { %v2823_v8 = vpop.xlane.xlu0 %2822 }
 0x2b4   : > { %v2805_v22 = vpop.xlane.xlu1 %2804 }
 0x2b5   : > { %v2824_v9 = vadd.f32 %v2823_v8, %v2805_v22 }
 0x2b7   : > { %v2859_v0 = vpop.xlane.xlu0 %2858 }
 0x2bb   : > { %v2841_v10 = vpop.xlane.xlu1 %2840 }
 0x2bc   : > { %v2842_v11 = vadd.f32 %v2841_v10, %v2824_v9 }
 0x2be   : > { %v2860_v12 = vadd.f32 %v2859_v0, %v2842_v11 }
 0x2bf   : > { %v2876_v34 = vpop.permute.xlu0 %2875 }
 0x2c0   : > { %v2861_v13 = vmul.f32 0.0009765625, %v2860_v12 }
 0x2c2   : > { %v2862_v14 = vadd.f32 1e-05, %v2861_v13 }
 0x2c4   : > { %3248 = vrsqrt.f32 %v2862_v14 }
 0x2d1   : > { %v3249_v16 = vpop.eup %3248 }
 0x2d2   : > { %v2864_v20 = vmul.f32 %v3249_v16, %v226_v15 }
 0x2d4   : > { %2867 = vperm.xlu1 %3245, %v2864_v20  }
 0x34f   : > { %v2868_v58 = vpop.permute.xlu1 %2867 }
 0x350   : > { %v2870_v61 = vmul.f32 %v2868_v58, %v3617_v21  ;;  %v2871_v32 = vmul.f32 %v2868_v58, %v3620_v23  ;;  %v2872_v25 = vmul.f32 %v2868_v58, %v3622_v24  ;;  %v2893_v30 = vmul.f32 %v2868_v58, %v3609_v17 }
 0x351   : > { %v2894_v35 = vmul.f32 %v2868_v58, %v3612_v18  ;;  %v2895_v37 = vmul.f32 %v2868_v58, %v3614_v19  ;;  %v2912_v38 = vmul.f32 %v2868_v58, %v2828_v49  ;;  %v2913_v39 = vmul.f32 %v2868_v58, %v2829_v56 }
 0x352   : > { %v2914_v40 = vmul.f32 %v2868_v58, %v2830_v57  ;;  %v2931_v41 = vmul.f32 %v2868_v58, %v3624_v28  ;;  %v2932_v42 = vmul.f32 %v2868_v58, %v3626_v31  ;;  %v2933_v21 = vmul.f32 %v2868_v58, %v3640_v36 }
 0x353   : > { %v2878_v43 = vadd.f32 %v2876_v34, %v2870_v61  ;;  %v2879_v23 = vadd.f32 %v2876_v34, %v2871_v32  ;;  %v2880_v44 = vadd.f32 %v2876_v34, %v2872_v25  ;;  %v2896_v24 = vadd.f32 %v2893_v30, %v2876_v34 }
 0x354   : > { %v2897_v17 = vadd.f32 %v2894_v35, %v2876_v34  ;;  %v2898_v18 = vadd.f32 %v2895_v37, %v2876_v34  ;;  %v2915_v19 = vadd.f32 %v2912_v38, %v2876_v34  ;;  %v2916_v28 = vadd.f32 %v2913_v39, %v2876_v34 }
 0x355   : > { %v2881_v31 = vmax.f32 %v2878_v43, 0.0  ;;  %v2882_v36 = vmax.f32 %v2879_v23, 0.0  ;;  %v2883_v45 = vmax.f32 %v2880_v44, 0.0  ;;  %v2899_v46 = vmax.f32 %v2896_v24, 0.0 }
 0x356   : > { %v2900_v47 = vmax.f32 %v2897_v17, 0.0  ;;  %v2901_v48 = vmax.f32 %v2898_v18, 0.0  ;;  %v2917_v49 = vadd.f32 %v2914_v40, %v2876_v34  ;;  %v2918_v50 = vmax.f32 %v2915_v19, 0.0 }
 0x357   : > { %2884 = vst [vmem:[%s3676_s26] sm:$0xff] %v2881_v31  ;;  %2885 = vst [vmem:[%s3676_s26 + $0x8] sm:$0xff] %v2882_v36  ;;  %v2919_v51 = vmax.f32 %v2916_v28, 0.0  ;;  %v2934_v52 = vadd.f32 %v2931_v41, %v2876_v34  ;;  %v2935_v53 = vadd.f32 %v2932_v42, %v2876_v34  ;;  %v2936_v54 = vadd.f32 %v2933_v21, %v2876_v34 }
 0x358   : > { %2886 = vst.msk [vmem:[%s3676_s26 + $0x10] sm:$0xff] %vm877_vm11, %v2883_v45  ;;  %3101 = vst [vmem:[%s3676_s26 + $0x18] sm:$0xff] %v2899_v46  ;;  %v2920_v55 = vmax.f32 %v2917_v49, 0.0 }
 0x359   : > { %3102 = vst [vmem:[%s3676_s26 + $0x20] sm:$0xff] %v2900_v47  ;;  %3103 = vst.msk [vmem:[%s3676_s26 + $0x28] sm:$0xff] %vm877_vm11, %v2901_v48  ;;  %v2937_v56 = vmax.f32 %v2934_v52, 0.0  ;;  %v2938_v57 = vmax.f32 %v2935_v53, 0.0  ;;  %v2939_v59 = vmax.f32 %v2936_v54, 0.0 }
 0x35a   : > { %3104 = vst [vmem:[%s3676_s26 + $0x30] sm:$0xff] %v2918_v50  ;;  %3105 = vst [vmem:[%s3676_s26 + $0x38] sm:$0xff] %v2919_v51 }
 0x35b   : > { %3106 = vst.msk [vmem:[%s3676_s26 + $0x40] sm:$0xff] %vm877_vm11, %v2920_v55  ;;  %3107 = vst [vmem:[%s3676_s26 + $0x48] sm:$0xff] %v2937_v56 }
 0x35c   : > { %3108 = vst [vmem:[%s3676_s26 + $0x50] sm:$0xff] %v2938_v57  ;;  %3109 = vst.msk [vmem:[%s3676_s26 + $0x58] sm:$0xff] %vm877_vm11, %v2939_v59 }
 0x35d PF: > { %s15_s18 = sadd.s32 1, %s3256_s18  }
 0x35e   : > { %p12_p4 = scmp.ge.s32.totalorder %s15_s18, 4  }
 0x360   :  { %14 = sbr.rel (!%p12_p4) target bundleno = 1 (0x1), region = 91 }

</bundles_post_ra>
